<compile_context>
chip_gen: v7x
topology: tpu7x:2x2x1
jax: 0.10.0
libtpu: 0.0.40
codegen_flags: <defaults>
</compile_context>

<pallas_src>
import functools
import math

import jax
import jax.numpy as jnp
from jax import lax
from jax.experimental import pallas as pl
from jax.experimental.pallas import tpu as pltpu  # noqa: F401  (TPU backend)

# ----------------------- small synthetic BERT config ------------------------
VOCAB = 100
HIDDEN = 32
HEADS = 4
HEAD_DIM = HIDDEN // HEADS
INTERMEDIATE = 64
LAYERS = 3                 # hidden_states has LAYERS+1 entries
LAYERS_USED = LAYERS - 1   # [-2] == output of encoder layer LAYERS-2 (0-indexed)
MAX_POS = 16
NUM_LABELS = 1
LN_EPS = 1e-12
CLS_PAD = 128              # lane-dense classifier output slab (sliced in wrapper)


# ------------------------------ fused kernel --------------------------------
def _layernorm(x, g, b):
    # E[x] / E[x^2] form: the two cross-lane reductions are independent and
    # can overlap (instead of reducing (x - mu)^2 after the mean reduce).
    mu = jnp.mean(x, axis=-1, keepdims=True)
    ms = jnp.mean(x * x, axis=-1, keepdims=True)
    var = ms - mu * mu
    return (x - mu) * lax.rsqrt(var + LN_EPS) * g + b


def _fused_forward_kernel(
    emb_ref,      # (B*S, D)        f32 activations (post embedding sum)
    bias_ref,     # (B, S)          f32 additive attention-mask bias
    gvec_ref,     # (8, 128)        f32: [0]=emb_ln_g [1]=emb_ln_b [2]=cls_b
    attn_w_ref,   # (L, 2D, 3D)     bf16: rows [0:D]=wqkv, rows [D:2D,0:D]=wo
    ffn_w1_ref,   # (L, D, I)       bf16
    ffn_w2_ref,   # (L, I, D)       bf16
    lvec_ref,     # (L, 8, 128)     f32 per-layer biases / LN params
    cls_w_ref,    # (D, CLS_PAD)    bf16 (1/S mean-pool factor pre-folded)
    out_ref,      # (B, CLS_PAD)    f32
    *, B, S,
):
    D = HIDDEN
    Hd = HEAD_DIM

    # embedding LayerNorm (f32)
    x = _layernorm(emb_ref[...], gvec_ref[0:1, :D], gvec_ref[1:2, :D])  # (B*S, D)

    # attention-mask bias broadcast ONCE to the score shape (hoisted out of
    # the head/layer loops).
    bias3 = jnp.broadcast_to(bias_ref[...].reshape(B, 1, S), (B, S, S))

    for l in range(LAYERS_USED):
        bqkv = lvec_ref[l, 0:1, :3 * D]
        bo = lvec_ref[l, 1:2, :D]
        ln1_g = lvec_ref[l, 2:3, :D]
        ln1_b = lvec_ref[l, 3:4, :D]
        b1 = lvec_ref[l, 4:5, :INTERMEDIATE]
        b2 = lvec_ref[l, 5:6, :D]
        ln2_g = lvec_ref[l, 6:7, :D]
        ln2_b = lvec_ref[l, 7:8, :D]

        # ---- fused QKV projection: one bf16 (B*S, D) x (D, 3D) matmul ----
        # (1/sqrt(head_dim) score scale is pre-folded into wq / bq.)
        qkv = jnp.dot(x.astype(jnp.bfloat16), attn_w_ref[l, :D, :],
                      preferred_element_type=jnp.float32) + bqkv        # (B*S, 3D)

        # ---- per-head attention; output projection accumulated per head ----
        # (no lane concatenation of per-head context tiles)
        attn_out = jnp.zeros((B * S, D), jnp.float32)
        for h in range(HEADS):
            qh = qkv[:, 0 * D + h * Hd: 0 * D + (h + 1) * Hd].reshape(B, S, Hd)
            kh = qkv[:, 1 * D + h * Hd: 1 * D + (h + 1) * Hd].reshape(B, S, Hd)
            vh = qkv[:, 2 * D + h * Hd: 2 * D + (h + 1) * Hd].reshape(B, S, Hd)
            s = jnp.einsum("bqd,bkd->bqk", qh, kh,
                           preferred_element_type=jnp.float32) + bias3
            m = jnp.max(s, axis=-1, keepdims=True)
            p = jnp.exp(s - m)
            p = p * pl.reciprocal(jnp.sum(p, axis=-1, keepdims=True), approx=True)
            ch = jnp.einsum("bqk,bkd->bqd", p, vh,
                            preferred_element_type=jnp.float32)
            wo_h = attn_w_ref[l, D + h * Hd: D + (h + 1) * Hd, :D]      # (Hd, D)
            attn_out = attn_out + jnp.dot(
                ch.reshape(B * S, Hd).astype(jnp.bfloat16), wo_h,
                preferred_element_type=jnp.float32)
        x = _layernorm(x + attn_out + bo, ln1_g, ln1_b)

        # ---- FFN ----
        hmid = jnp.dot(x.astype(jnp.bfloat16), ffn_w1_ref[l],
                       preferred_element_type=jnp.float32) + b1
        # TODO(synk): HF BERT uses erf-GELU; tanh approximation kept for robust lowering.
        hmid = jax.nn.gelu(hmid, approximate=True)
        ffn_out = jnp.dot(hmid.astype(jnp.bfloat16), ffn_w2_ref[l],
                          preferred_element_type=jnp.float32) + b2
        x = _layernorm(x + ffn_out, ln2_g, ln2_b)

    # ---- mean pool over sequence + classifier (lane-padded output) ----
    # 1/S is folded into cls_w at pack time, so a plain sum suffices here.
    pooled = jnp.sum(x.reshape(B, S, D), axis=1)                        # (B, D)
    # TODO(synk): nn.Dropout(0.1) is identity in inference mode; training-mode
    # stochastic dropout not implemented.
    logits = jnp.dot(pooled.astype(jnp.bfloat16), cls_w_ref[...],
                     preferred_element_type=jnp.float32) + gvec_ref[2:3, :]
    out_ref[...] = logits.astype(out_ref.dtype)


# ------------------------------ parameter init ------------------------------
def init_params(key):
    def nrm(k, shape):
        return 0.02 * jax.random.normal(k, shape, dtype=jnp.float32)

    keys = iter(jax.random.split(key, 8 + LAYERS * 8))
    params = {
        "word_emb": nrm(next(keys), (VOCAB, HIDDEN)),
        "pos_emb": nrm(next(keys), (MAX_POS, HIDDEN)),
        "type_emb": nrm(next(keys), (2, HIDDEN)),
        "emb_ln_g": jnp.ones((HIDDEN,), jnp.float32),
        "emb_ln_b": jnp.zeros((HIDDEN,), jnp.float32),
        "cls_w": nrm(next(keys), (HIDDEN, NUM_LABELS)),
        "cls_b": jnp.zeros((NUM_LABELS,), jnp.float32),
        "layers": [],
    }
    for _ in range(LAYERS):
        lp = {
            "wq": nrm(next(keys), (HIDDEN, HIDDEN)), "bq": jnp.zeros((HIDDEN,), jnp.float32),
            "wk": nrm(next(keys), (HIDDEN, HIDDEN)), "bk": jnp.zeros((HIDDEN,), jnp.float32),
            "wv": nrm(next(keys), (HIDDEN, HIDDEN)), "bv": jnp.zeros((HIDDEN,), jnp.float32),
            "wo": nrm(next(keys), (HIDDEN, HIDDEN)), "bo": jnp.zeros((HIDDEN,), jnp.float32),
            "ln1_g": jnp.ones((HIDDEN,), jnp.float32), "ln1_b": jnp.zeros((HIDDEN,), jnp.float32),
            "w1": nrm(next(keys), (HIDDEN, INTERMEDIATE)), "b1": jnp.zeros((INTERMEDIATE,), jnp.float32),
            "w2": nrm(next(keys), (INTERMEDIATE, HIDDEN)), "b2": jnp.zeros((HIDDEN,), jnp.float32),
            "ln2_g": jnp.ones((HIDDEN,), jnp.float32), "ln2_b": jnp.zeros((HIDDEN,), jnp.float32),
        }
        params["layers"].append(lp)
    return params


def pack_params(params, seq_len):
    """Pack weights into a few lane-dense slabs for the fused kernel.

    Only the LAYERS-1 layers that feed hidden_states[-2] are packed. QKV is
    fused; the 1/sqrt(head_dim) score scale is folded into wq/bq; the 1/seq_len
    mean-pool factor is folded into the classifier weights; MXU weight slabs
    are stored in bf16; biases / LayerNorm vectors stay f32.
    """
    lyrs = params["layers"][:LAYERS_USED]
    L = LAYERS_USED
    D, I = HIDDEN, INTERMEDIATE
    scale = 1.0 / math.sqrt(HEAD_DIM)

    attn_w = jnp.zeros((L, 2 * D, 3 * D), jnp.float32)
    lvec = jnp.zeros((L, 8, 128), jnp.float32)
    for i, lp in enumerate(lyrs):
        wqkv = jnp.concatenate([lp["wq"] * scale, lp["wk"], lp["wv"]], axis=1)  # (D, 3D)
        attn_w = attn_w.at[i, :D, :].set(wqkv)
        attn_w = attn_w.at[i, D:2 * D, :D].set(lp["wo"])
        bqkv = jnp.concatenate([lp["bq"] * scale, lp["bk"], lp["bv"]])          # (3D,)
        lvec = lvec.at[i, 0, :3 * D].set(bqkv)
        lvec = lvec.at[i, 1, :D].set(lp["bo"])
        lvec = lvec.at[i, 2, :D].set(lp["ln1_g"])
        lvec = lvec.at[i, 3, :D].set(lp["ln1_b"])
        lvec = lvec.at[i, 4, :I].set(lp["b1"])
        lvec = lvec.at[i, 5, :D].set(lp["b2"])
        lvec = lvec.at[i, 6, :D].set(lp["ln2_g"])
        lvec = lvec.at[i, 7, :D].set(lp["ln2_b"])

    ffn_w1 = jnp.stack([lp["w1"] for lp in lyrs]).astype(jnp.bfloat16)          # (L, D, I)
    ffn_w2 = jnp.stack([lp["w2"] for lp in lyrs]).astype(jnp.bfloat16)          # (L, I, D)

    gvec = jnp.zeros((8, 128), jnp.float32)
    gvec = gvec.at[0, :D].set(params["emb_ln_g"])
    gvec = gvec.at[1, :D].set(params["emb_ln_b"])
    gvec = gvec.at[2, :NUM_LABELS].set(params["cls_b"])

    cls_w = jnp.zeros((D, CLS_PAD), jnp.float32)
    cls_w = cls_w.at[:, :NUM_LABELS].set(params["cls_w"] * (1.0 / seq_len))

    return {
        "word_emb": params["word_emb"],
        "pos_emb": params["pos_emb"],
        "type_emb": params["type_emb"],
        "gvec": gvec,
        "attn_w": attn_w.astype(jnp.bfloat16),
        "ffn_w1": ffn_w1,
        "ffn_w2": ffn_w2,
        "lvec": lvec,
        "cls_w": cls_w.astype(jnp.bfloat16),
    }


# ------------------------------- model forward -------------------------------
def base_model_nlp_forward(packed, input_ids, att_masks):
    # NOTE: packed must have been built with pack_params(seq_len == input_ids.shape[1]),
    # because the 1/S mean-pool factor is folded into cls_w at pack time.
    B, S = input_ids.shape

    # embedding gathers are plain-JAX glue; everything else is one Pallas kernel
    emb = (
        packed["word_emb"][input_ids]
        + packed["pos_emb"][jnp.arange(S)][None, :, :]
        + packed["type_emb"][0][None, None, :]
    ).reshape(B * S, HIDDEN)

    # additive attention-mask bias: (B, S), 0 for keep / -10000 for pad
    bias = (1.0 - att_masks.astype(jnp.float32)) * -10000.0

    operands = (
        emb, bias,
        packed["gvec"],
        packed["attn_w"], packed["ffn_w1"], packed["ffn_w2"],
        packed["lvec"],
        packed["cls_w"],
    )

    def full_spec(shape):
        return pl.BlockSpec(shape, lambda: (0,) * len(shape))

    out = pl.pallas_call(
        functools.partial(_fused_forward_kernel, B=B, S=S),
        out_shape=jax.ShapeDtypeStruct((B, CLS_PAD), jnp.float32),
        in_specs=[full_spec(op.shape) for op in operands],
        out_specs=full_spec((B, CLS_PAD)),
    )(*operands)

    return out[:, :NUM_LABELS]   # (B, NUM_LABELS)


# ----------------------------------- main ------------------------------------
if __name__ == "__main__":
    key = jax.random.PRNGKey(0)
    pkey, ikey = jax.random.split(key)

    B, S = 2, 8
    packed = pack_params(init_params(pkey), seq_len=S)

    input_ids = jax.random.randint(ikey, (B, S), 0, VOCAB, dtype=jnp.int32)
    att_masks = jnp.array(
        [[1, 1, 1, 1, 1, 1, 0, 0],
         [1, 1, 1, 1, 0, 0, 0, 0]], dtype=jnp.int32)

    logits = jax.jit(base_model_nlp_forward)(packed, input_ids, att_masks)
    logits = jax.block_until_ready(logits)
    assert logits.shape == (B, NUM_LABELS)
    print("KERNEL_OK")
</pallas_src>

<mosaic_0001>
module attributes {stable_mosaic.version = 11 : i64} {
  func.func @_fused_forward_kernel(%arg0: memref<16x32xf32, #tpu.memory_space<vmem>>, %arg1: memref<2x8xf32, #tpu.memory_space<vmem>>, %arg2: memref<8x128xf32, #tpu.memory_space<vmem>>, %arg3: memref<2x64x96xbf16, #tpu.memory_space<vmem>>, %arg4: memref<2x32x64xbf16, #tpu.memory_space<vmem>>, %arg5: memref<2x64x32xbf16, #tpu.memory_space<vmem>>, %arg6: memref<2x8x128xf32, #tpu.memory_space<vmem>>, %arg7: memref<32x128xbf16, #tpu.memory_space<vmem>>, %arg8: memref<2x128xf32, #tpu.memory_space<vmem>>) attributes {dimension_semantics = [], scalar_prefetch = 0 : i64, scratch_operands = 0 : i64, tpu.core_type = #tpu.core_type<tc>} {
    %c0 = arith.constant 0 : index
    %c0_0 = arith.constant 0 : index
    %0 = vector.load %arg0[%c0, %c0_0] : memref<16x32xf32, #tpu.memory_space<vmem>>, vector<16x32xf32>
    %c0_1 = arith.constant 0 : index
    %c0_2 = arith.constant 0 : index
    %1 = vector.load %arg2[%c0_1, %c0_2] : memref<8x128xf32, #tpu.memory_space<vmem>>, vector<1x32xf32>
    %c1 = arith.constant 1 : index
    %c0_3 = arith.constant 0 : index
    %2 = vector.load %arg2[%c1, %c0_3] : memref<8x128xf32, #tpu.memory_space<vmem>>, vector<1x32xf32>
    %cst = arith.constant dense<0.000000e+00> : vector<16xf32>
    %3 = vector.multi_reduction <add>, %0, %cst [1] : vector<16x32xf32> to vector<16xf32>
    %4 = vector.shape_cast %3 : vector<16xf32> to vector<16x1xf32>
    %cst_4 = arith.constant 3.200000e+01 : f32
    %5 = vector.broadcast %cst_4 : f32 to vector<16x1xf32>
    %6 = arith.divf %4, %5 : vector<16x1xf32>
    %7 = arith.mulf %0, %0 : vector<16x32xf32>
    %cst_5 = arith.constant dense<0.000000e+00> : vector<16xf32>
    %8 = vector.multi_reduction <add>, %7, %cst_5 [1] : vector<16x32xf32> to vector<16xf32>
    %9 = vector.shape_cast %8 : vector<16xf32> to vector<16x1xf32>
    %cst_6 = arith.constant 3.200000e+01 : f32
    %10 = vector.broadcast %cst_6 : f32 to vector<16x1xf32>
    %11 = arith.divf %9, %10 : vector<16x1xf32>
    %12 = arith.mulf %6, %6 : vector<16x1xf32>
    %13 = arith.subf %11, %12 : vector<16x1xf32>
    %14 = vector.broadcast %6 : vector<16x1xf32> to vector<16x32xf32>
    %15 = arith.subf %0, %14 : vector<16x32xf32>
    %cst_7 = arith.constant 9.99999996E-13 : f32
    %16 = vector.broadcast %cst_7 : f32 to vector<16x1xf32>
    %17 = arith.addf %13, %16 : vector<16x1xf32>
    %18 = math.rsqrt %17 : vector<16x1xf32>
    %19 = vector.broadcast %18 : vector<16x1xf32> to vector<16x32xf32>
    %20 = arith.mulf %15, %19 : vector<16x32xf32>
    %21 = vector.broadcast %1 : vector<1x32xf32> to vector<16x32xf32>
    %22 = arith.mulf %20, %21 : vector<16x32xf32>
    %23 = vector.broadcast %2 : vector<1x32xf32> to vector<16x32xf32>
    %24 = arith.addf %22, %23 : vector<16x32xf32>
    %c0_8 = arith.constant 0 : index
    %c0_9 = arith.constant 0 : index
    %25 = vector.load %arg1[%c0_8, %c0_9] : memref<2x8xf32, #tpu.memory_space<vmem>>, vector<2x8xf32>
    %26 = vector.shape_cast %25 : vector<2x8xf32> to vector<2x1x8xf32>
    %27 = vector.shape_cast %26 : vector<2x1x8xf32> to vector<2x1x8xf32>
    %28 = vector.broadcast %27 : vector<2x1x8xf32> to vector<2x8x8xf32>
    %c0_10 = arith.constant 0 : index
    %c0_11 = arith.constant 0 : index
    %c0_12 = arith.constant 0 : index
    %29 = vector.load %arg6[%c0_10, %c0_11, %c0_12] : memref<2x8x128xf32, #tpu.memory_space<vmem>>, vector<1x1x96xf32>
    %30 = vector.shape_cast %29 : vector<1x1x96xf32> to vector<1x96xf32>
    %c0_13 = arith.constant 0 : index
    %c1_14 = arith.constant 1 : index
    %c0_15 = arith.constant 0 : index
    %31 = vector.load %arg6[%c0_13, %c1_14, %c0_15] : memref<2x8x128xf32, #tpu.memory_space<vmem>>, vector<1x1x32xf32>
    %32 = vector.shape_cast %31 : vector<1x1x32xf32> to vector<1x32xf32>
    %c0_16 = arith.constant 0 : index
    %c2 = arith.constant 2 : index
    %c0_17 = arith.constant 0 : index
    %33 = vector.load %arg6[%c0_16, %c2, %c0_17] : memref<2x8x128xf32, #tpu.memory_space<vmem>>, vector<1x1x32xf32>
    %34 = vector.shape_cast %33 : vector<1x1x32xf32> to vector<1x32xf32>
    %c0_18 = arith.constant 0 : index
    %c3 = arith.constant 3 : index
    %c0_19 = arith.constant 0 : index
    %35 = vector.load %arg6[%c0_18, %c3, %c0_19] : memref<2x8x128xf32, #tpu.memory_space<vmem>>, vector<1x1x32xf32>
    %36 = vector.shape_cast %35 : vector<1x1x32xf32> to vector<1x32xf32>
    %c0_20 = arith.constant 0 : index
    %c4 = arith.constant 4 : index
    %c0_21 = arith.constant 0 : index
    %37 = vector.load %arg6[%c0_20, %c4, %c0_21] : memref<2x8x128xf32, #tpu.memory_space<vmem>>, vector<1x1x64xf32>
    %38 = vector.shape_cast %37 : vector<1x1x64xf32> to vector<1x64xf32>
    %c0_22 = arith.constant 0 : index
    %c5 = arith.constant 5 : index
    %c0_23 = arith.constant 0 : index
    %39 = vector.load %arg6[%c0_22, %c5, %c0_23] : memref<2x8x128xf32, #tpu.memory_space<vmem>>, vector<1x1x32xf32>
    %40 = vector.shape_cast %39 : vector<1x1x32xf32> to vector<1x32xf32>
    %c0_24 = arith.constant 0 : index
    %c6 = arith.constant 6 : index
    %c0_25 = arith.constant 0 : index
    %41 = vector.load %arg6[%c0_24, %c6, %c0_25] : memref<2x8x128xf32, #tpu.memory_space<vmem>>, vector<1x1x32xf32>
    %42 = vector.shape_cast %41 : vector<1x1x32xf32> to vector<1x32xf32>
    %c0_26 = arith.constant 0 : index
    %c7 = arith.constant 7 : index
    %c0_27 = arith.constant 0 : index
    %43 = vector.load %arg6[%c0_26, %c7, %c0_27] : memref<2x8x128xf32, #tpu.memory_space<vmem>>, vector<1x1x32xf32>
    %44 = vector.shape_cast %43 : vector<1x1x32xf32> to vector<1x32xf32>
    %45 = arith.truncf %24 : vector<16x32xf32> to vector<16x32xbf16>
    %c0_28 = arith.constant 0 : index
    %c0_29 = arith.constant 0 : index
    %c0_30 = arith.constant 0 : index
    %46 = vector.load %arg3[%c0_28, %c0_29, %c0_30] : memref<2x64x96xbf16, #tpu.memory_space<vmem>>, vector<1x32x96xbf16>
    %47 = vector.shape_cast %46 : vector<1x32x96xbf16> to vector<32x96xbf16>
    %cst_31 = arith.constant dense<0.000000e+00> : vector<16x96xf32>
    %48 = tpu.matmul %45, %47, %cst_31 {dimension_numbers = #tpu.dot_dimension_numbers<[1], [0], [0], [1], [0, 0, 1, 1], [], []>} : vector<16x32xbf16>, vector<32x96xbf16>, vector<16x96xf32> -> vector<16x96xf32>
    %49 = vector.broadcast %30 : vector<1x96xf32> to vector<16x96xf32>
    %50 = arith.addf %48, %49 : vector<16x96xf32>
    %cst_32 = arith.constant 0.000000e+00 : f32
    %51 = vector.broadcast %cst_32 : f32 to vector<16x32xf32>
    %52 = vector.extract_strided_slice %50 {offsets = [0, 0], sizes = [16, 8], strides = [1, 1]} : vector<16x96xf32> to vector<16x8xf32>
    %53 = vector.shape_cast %52 : vector<16x8xf32> to vector<2x8x8xf32>
    %54 = vector.extract_strided_slice %50 {offsets = [0, 32], sizes = [16, 8], strides = [1, 1]} : vector<16x96xf32> to vector<16x8xf32>
    %55 = vector.shape_cast %54 : vector<16x8xf32> to vector<2x8x8xf32>
    %56 = vector.extract_strided_slice %50 {offsets = [0, 64], sizes = [16, 8], strides = [1, 1]} : vector<16x96xf32> to vector<16x8xf32>
    %57 = vector.shape_cast %56 : vector<16x8xf32> to vector<2x8x8xf32>
    "tpu.trace_start"() <{level = 10 : i32, message = "bqd,bkd->bqk"}> : () -> ()
    %cst_33 = arith.constant dense<0.000000e+00> : vector<2x8x8xf32>
    %58 = tpu.matmul %53, %55, %cst_33 {dimension_numbers = #tpu.dot_dimension_numbers<[2], [2], [1], [1], [0, 0, 0, 1, 1, 1], [0], [0]>} : vector<2x8x8xf32>, vector<2x8x8xf32>, vector<2x8x8xf32> -> vector<2x8x8xf32>
    "tpu.trace_stop"() : () -> ()
    %59 = arith.addf %58, %28 : vector<2x8x8xf32>
    %cst_34 = arith.constant dense<0xFF800000> : vector<2x8xf32>
    %60 = vector.multi_reduction <maximumf>, %59, %cst_34 [2] : vector<2x8x8xf32> to vector<2x8xf32>
    %61 = vector.shape_cast %60 : vector<2x8xf32> to vector<2x8x1xf32>
    %62 = vector.broadcast %61 : vector<2x8x1xf32> to vector<2x8x8xf32>
    %63 = arith.subf %59, %62 : vector<2x8x8xf32>
    %64 = math.exp %63 : vector<2x8x8xf32>
    %cst_35 = arith.constant dense<0.000000e+00> : vector<2x8xf32>
    %65 = vector.multi_reduction <add>, %64, %cst_35 [2] : vector<2x8x8xf32> to vector<2x8xf32>
    %66 = vector.shape_cast %65 : vector<2x8xf32> to vector<2x8x1xf32>
    %67 = tpu.reciprocal %66 {approx = true} : vector<2x8x1xf32> -> vector<2x8x1xf32>
    %68 = vector.broadcast %67 : vector<2x8x1xf32> to vector<2x8x8xf32>
    %69 = arith.mulf %64, %68 : vector<2x8x8xf32>
    "tpu.trace_start"() <{level = 10 : i32, message = "bqk,bkd->bqd"}> : () -> ()
    %cst_36 = arith.constant dense<0.000000e+00> : vector<2x8x8xf32>
    %70 = tpu.matmul %69, %57, %cst_36 {dimension_numbers = #tpu.dot_dimension_numbers<[2], [1], [1], [2], [0, 0, 0, 1, 1, 2], [0], [0]>} : vector<2x8x8xf32>, vector<2x8x8xf32>, vector<2x8x8xf32> -> vector<2x8x8xf32>
    "tpu.trace_stop"() : () -> ()
    %c0_37 = arith.constant 0 : index
    %c32 = arith.constant 32 : index
    %c0_38 = arith.constant 0 : index
    %71 = vector.load %arg3[%c0_37, %c32, %c0_38] : memref<2x64x96xbf16, #tpu.memory_space<vmem>>, vector<1x8x32xbf16>
    %72 = vector.shape_cast %71 : vector<1x8x32xbf16> to vector<8x32xbf16>
    %73 = vector.shape_cast %70 : vector<2x8x8xf32> to vector<16x8xf32>
    %74 = arith.truncf %73 : vector<16x8xf32> to vector<16x8xbf16>
    %cst_39 = arith.constant dense<0.000000e+00> : vector<16x32xf32>
    %75 = tpu.matmul %74, %72, %cst_39 {dimension_numbers = #tpu.dot_dimension_numbers<[1], [0], [0], [1], [0, 0, 1, 1], [], []>} : vector<16x8xbf16>, vector<8x32xbf16>, vector<16x32xf32> -> vector<16x32xf32>
    %76 = arith.addf %51, %75 : vector<16x32xf32>
    %77 = vector.extract_strided_slice %50 {offsets = [0, 8], sizes = [16, 8], strides = [1, 1]} : vector<16x96xf32> to vector<16x8xf32>
    %78 = vector.shape_cast %77 : vector<16x8xf32> to vector<2x8x8xf32>
    %79 = vector.extract_strided_slice %50 {offsets = [0, 40], sizes = [16, 8], strides = [1, 1]} : vector<16x96xf32> to vector<16x8xf32>
    %80 = vector.shape_cast %79 : vector<16x8xf32> to vector<2x8x8xf32>
    %81 = vector.extract_strided_slice %50 {offsets = [0, 72], sizes = [16, 8], strides = [1, 1]} : vector<16x96xf32> to vector<16x8xf32>
    %82 = vector.shape_cast %81 : vector<16x8xf32> to vector<2x8x8xf32>
    "tpu.trace_start"() <{level = 10 : i32, message = "bqd,bkd->bqk"}> : () -> ()
    %cst_40 = arith.constant dense<0.000000e+00> : vector<2x8x8xf32>
    %83 = tpu.matmul %78, %80, %cst_40 {dimension_numbers = #tpu.dot_dimension_numbers<[2], [2], [1], [1], [0, 0, 0, 1, 1, 1], [0], [0]>} : vector<2x8x8xf32>, vector<2x8x8xf32>, vector<2x8x8xf32> -> vector<2x8x8xf32>
    "tpu.trace_stop"() : () -> ()
    %84 = arith.addf %83, %28 : vector<2x8x8xf32>
    %cst_41 = arith.constant dense<0xFF800000> : vector<2x8xf32>
    %85 = vector.multi_reduction <maximumf>, %84, %cst_41 [2] : vector<2x8x8xf32> to vector<2x8xf32>
    %86 = vector.shape_cast %85 : vector<2x8xf32> to vector<2x8x1xf32>
    %87 = vector.broadcast %86 : vector<2x8x1xf32> to vector<2x8x8xf32>
    %88 = arith.subf %84, %87 : vector<2x8x8xf32>
    %89 = math.exp %88 : vector<2x8x8xf32>
    %cst_42 = arith.constant dense<0.000000e+00> : vector<2x8xf32>
    %90 = vector.multi_reduction <add>, %89, %cst_42 [2] : vector<2x8x8xf32> to vector<2x8xf32>
    %91 = vector.shape_cast %90 : vector<2x8xf32> to vector<2x8x1xf32>
    %92 = tpu.reciprocal %91 {approx = true} : vector<2x8x1xf32> -> vector<2x8x1xf32>
    %93 = vector.broadcast %92 : vector<2x8x1xf32> to vector<2x8x8xf32>
    %94 = arith.mulf %89, %93 : vector<2x8x8xf32>
    "tpu.trace_start"() <{level = 10 : i32, message = "bqk,bkd->bqd"}> : () -> ()
    %cst_43 = arith.constant dense<0.000000e+00> : vector<2x8x8xf32>
    %95 = tpu.matmul %94, %82, %cst_43 {dimension_numbers = #tpu.dot_dimension_numbers<[2], [1], [1], [2], [0, 0, 0, 1, 1, 2], [0], [0]>} : vector<2x8x8xf32>, vector<2x8x8xf32>, vector<2x8x8xf32> -> vector<2x8x8xf32>
    "tpu.trace_stop"() : () -> ()
    %c0_44 = arith.constant 0 : index
    %c40 = arith.constant 40 : index
    %c0_45 = arith.constant 0 : index
    %96 = vector.load %arg3[%c0_44, %c40, %c0_45] : memref<2x64x96xbf16, #tpu.memory_space<vmem>>, vector<1x8x32xbf16>
    %97 = vector.shape_cast %96 : vector<1x8x32xbf16> to vector<8x32xbf16>
    %98 = vector.shape_cast %95 : vector<2x8x8xf32> to vector<16x8xf32>
    %99 = arith.truncf %98 : vector<16x8xf32> to vector<16x8xbf16>
    %cst_46 = arith.constant dense<0.000000e+00> : vector<16x32xf32>
    %100 = tpu.matmul %99, %97, %cst_46 {dimension_numbers = #tpu.dot_dimension_numbers<[1], [0], [0], [1], [0, 0, 1, 1], [], []>} : vector<16x8xbf16>, vector<8x32xbf16>, vector<16x32xf32> -> vector<16x32xf32>
    %101 = arith.addf %76, %100 : vector<16x32xf32>
    %102 = vector.extract_strided_slice %50 {offsets = [0, 16], sizes = [16, 8], strides = [1, 1]} : vector<16x96xf32> to vector<16x8xf32>
    %103 = vector.shape_cast %102 : vector<16x8xf32> to vector<2x8x8xf32>
    %104 = vector.extract_strided_slice %50 {offsets = [0, 48], sizes = [16, 8], strides = [1, 1]} : vector<16x96xf32> to vector<16x8xf32>
    %105 = vector.shape_cast %104 : vector<16x8xf32> to vector<2x8x8xf32>
    %106 = vector.extract_strided_slice %50 {offsets = [0, 80], sizes = [16, 8], strides = [1, 1]} : vector<16x96xf32> to vector<16x8xf32>
    %107 = vector.shape_cast %106 : vector<16x8xf32> to vector<2x8x8xf32>
    "tpu.trace_start"() <{level = 10 : i32, message = "bqd,bkd->bqk"}> : () -> ()
    %cst_47 = arith.constant dense<0.000000e+00> : vector<2x8x8xf32>
    %108 = tpu.matmul %103, %105, %cst_47 {dimension_numbers = #tpu.dot_dimension_numbers<[2], [2], [1], [1], [0, 0, 0, 1, 1, 1], [0], [0]>} : vector<2x8x8xf32>, vector<2x8x8xf32>, vector<2x8x8xf32> -> vector<2x8x8xf32>
    "tpu.trace_stop"() : () -> ()
    %109 = arith.addf %108, %28 : vector<2x8x8xf32>
    %cst_48 = arith.constant dense<0xFF800000> : vector<2x8xf32>
    %110 = vector.multi_reduction <maximumf>, %109, %cst_48 [2] : vector<2x8x8xf32> to vector<2x8xf32>
    %111 = vector.shape_cast %110 : vector<2x8xf32> to vector<2x8x1xf32>
    %112 = vector.broadcast %111 : vector<2x8x1xf32> to vector<2x8x8xf32>
    %113 = arith.subf %109, %112 : vector<2x8x8xf32>
    %114 = math.exp %113 : vector<2x8x8xf32>
    %cst_49 = arith.constant dense<0.000000e+00> : vector<2x8xf32>
    %115 = vector.multi_reduction <add>, %114, %cst_49 [2] : vector<2x8x8xf32> to vector<2x8xf32>
    %116 = vector.shape_cast %115 : vector<2x8xf32> to vector<2x8x1xf32>
    %117 = tpu.reciprocal %116 {approx = true} : vector<2x8x1xf32> -> vector<2x8x1xf32>
    %118 = vector.broadcast %117 : vector<2x8x1xf32> to vector<2x8x8xf32>
    %119 = arith.mulf %114, %118 : vector<2x8x8xf32>
    "tpu.trace_start"() <{level = 10 : i32, message = "bqk,bkd->bqd"}> : () -> ()
    %cst_50 = arith.constant dense<0.000000e+00> : vector<2x8x8xf32>
    %120 = tpu.matmul %119, %107, %cst_50 {dimension_numbers = #tpu.dot_dimension_numbers<[2], [1], [1], [2], [0, 0, 0, 1, 1, 2], [0], [0]>} : vector<2x8x8xf32>, vector<2x8x8xf32>, vector<2x8x8xf32> -> vector<2x8x8xf32>
    "tpu.trace_stop"() : () -> ()
    %c0_51 = arith.constant 0 : index
    %c48 = arith.constant 48 : index
    %c0_52 = arith.constant 0 : index
    %121 = vector.load %arg3[%c0_51, %c48, %c0_52] : memref<2x64x96xbf16, #tpu.memory_space<vmem>>, vector<1x8x32xbf16>
    %122 = vector.shape_cast %121 : vector<1x8x32xbf16> to vector<8x32xbf16>
    %123 = vector.shape_cast %120 : vector<2x8x8xf32> to vector<16x8xf32>
    %124 = arith.truncf %123 : vector<16x8xf32> to vector<16x8xbf16>
    %cst_53 = arith.constant dense<0.000000e+00> : vector<16x32xf32>
    %125 = tpu.matmul %124, %122, %cst_53 {dimension_numbers = #tpu.dot_dimension_numbers<[1], [0], [0], [1], [0, 0, 1, 1], [], []>} : vector<16x8xbf16>, vector<8x32xbf16>, vector<16x32xf32> -> vector<16x32xf32>
    %126 = arith.addf %101, %125 : vector<16x32xf32>
    %127 = vector.extract_strided_slice %50 {offsets = [0, 24], sizes = [16, 8], strides = [1, 1]} : vector<16x96xf32> to vector<16x8xf32>
    %128 = vector.shape_cast %127 : vector<16x8xf32> to vector<2x8x8xf32>
    %129 = vector.extract_strided_slice %50 {offsets = [0, 56], sizes = [16, 8], strides = [1, 1]} : vector<16x96xf32> to vector<16x8xf32>
    %130 = vector.shape_cast %129 : vector<16x8xf32> to vector<2x8x8xf32>
    %131 = vector.extract_strided_slice %50 {offsets = [0, 88], sizes = [16, 8], strides = [1, 1]} : vector<16x96xf32> to vector<16x8xf32>
    %132 = vector.shape_cast %131 : vector<16x8xf32> to vector<2x8x8xf32>
    "tpu.trace_start"() <{level = 10 : i32, message = "bqd,bkd->bqk"}> : () -> ()
    %cst_54 = arith.constant dense<0.000000e+00> : vector<2x8x8xf32>
    %133 = tpu.matmul %128, %130, %cst_54 {dimension_numbers = #tpu.dot_dimension_numbers<[2], [2], [1], [1], [0, 0, 0, 1, 1, 1], [0], [0]>} : vector<2x8x8xf32>, vector<2x8x8xf32>, vector<2x8x8xf32> -> vector<2x8x8xf32>
    "tpu.trace_stop"() : () -> ()
    %134 = arith.addf %133, %28 : vector<2x8x8xf32>
    %cst_55 = arith.constant dense<0xFF800000> : vector<2x8xf32>
    %135 = vector.multi_reduction <maximumf>, %134, %cst_55 [2] : vector<2x8x8xf32> to vector<2x8xf32>
    %136 = vector.shape_cast %135 : vector<2x8xf32> to vector<2x8x1xf32>
    %137 = vector.broadcast %136 : vector<2x8x1xf32> to vector<2x8x8xf32>
    %138 = arith.subf %134, %137 : vector<2x8x8xf32>
    %139 = math.exp %138 : vector<2x8x8xf32>
    %cst_56 = arith.constant dense<0.000000e+00> : vector<2x8xf32>
    %140 = vector.multi_reduction <add>, %139, %cst_56 [2] : vector<2x8x8xf32> to vector<2x8xf32>
    %141 = vector.shape_cast %140 : vector<2x8xf32> to vector<2x8x1xf32>
    %142 = tpu.reciprocal %141 {approx = true} : vector<2x8x1xf32> -> vector<2x8x1xf32>
    %143 = vector.broadcast %142 : vector<2x8x1xf32> to vector<2x8x8xf32>
    %144 = arith.mulf %139, %143 : vector<2x8x8xf32>
    "tpu.trace_start"() <{level = 10 : i32, message = "bqk,bkd->bqd"}> : () -> ()
    %cst_57 = arith.constant dense<0.000000e+00> : vector<2x8x8xf32>
    %145 = tpu.matmul %144, %132, %cst_57 {dimension_numbers = #tpu.dot_dimension_numbers<[2], [1], [1], [2], [0, 0, 0, 1, 1, 2], [0], [0]>} : vector<2x8x8xf32>, vector<2x8x8xf32>, vector<2x8x8xf32> -> vector<2x8x8xf32>
    "tpu.trace_stop"() : () -> ()
    %c0_58 = arith.constant 0 : index
    %c56 = arith.constant 56 : index
    %c0_59 = arith.constant 0 : index
    %146 = vector.load %arg3[%c0_58, %c56, %c0_59] : memref<2x64x96xbf16, #tpu.memory_space<vmem>>, vector<1x8x32xbf16>
    %147 = vector.shape_cast %146 : vector<1x8x32xbf16> to vector<8x32xbf16>
    %148 = vector.shape_cast %145 : vector<2x8x8xf32> to vector<16x8xf32>
    %149 = arith.truncf %148 : vector<16x8xf32> to vector<16x8xbf16>
    %cst_60 = arith.constant dense<0.000000e+00> : vector<16x32xf32>
    %150 = tpu.matmul %149, %147, %cst_60 {dimension_numbers = #tpu.dot_dimension_numbers<[1], [0], [0], [1], [0, 0, 1, 1], [], []>} : vector<16x8xbf16>, vector<8x32xbf16>, vector<16x32xf32> -> vector<16x32xf32>
    %151 = arith.addf %126, %150 : vector<16x32xf32>
    %152 = arith.addf %24, %151 : vector<16x32xf32>
    %153 = vector.broadcast %32 : vector<1x32xf32> to vector<16x32xf32>
    %154 = arith.addf %152, %153 : vector<16x32xf32>
    %cst_61 = arith.constant dense<0.000000e+00> : vector<16xf32>
    %155 = vector.multi_reduction <add>, %154, %cst_61 [1] : vector<16x32xf32> to vector<16xf32>
    %156 = vector.shape_cast %155 : vector<16xf32> to vector<16x1xf32>
    %cst_62 = arith.constant 3.200000e+01 : f32
    %157 = vector.broadcast %cst_62 : f32 to vector<16x1xf32>
    %158 = arith.divf %156, %157 : vector<16x1xf32>
    %159 = arith.mulf %154, %154 : vector<16x32xf32>
    %cst_63 = arith.constant dense<0.000000e+00> : vector<16xf32>
    %160 = vector.multi_reduction <add>, %159, %cst_63 [1] : vector<16x32xf32> to vector<16xf32>
    %161 = vector.shape_cast %160 : vector<16xf32> to vector<16x1xf32>
    %cst_64 = arith.constant 3.200000e+01 : f32
    %162 = vector.broadcast %cst_64 : f32 to vector<16x1xf32>
    %163 = arith.divf %161, %162 : vector<16x1xf32>
    %164 = arith.mulf %158, %158 : vector<16x1xf32>
    %165 = arith.subf %163, %164 : vector<16x1xf32>
    %166 = vector.broadcast %158 : vector<16x1xf32> to vector<16x32xf32>
    %167 = arith.subf %154, %166 : vector<16x32xf32>
    %cst_65 = arith.constant 9.99999996E-13 : f32
    %168 = vector.broadcast %cst_65 : f32 to vector<16x1xf32>
    %169 = arith.addf %165, %168 : vector<16x1xf32>
    %170 = math.rsqrt %169 : vector<16x1xf32>
    %171 = vector.broadcast %170 : vector<16x1xf32> to vector<16x32xf32>
    %172 = arith.mulf %167, %171 : vector<16x32xf32>
    %173 = vector.broadcast %34 : vector<1x32xf32> to vector<16x32xf32>
    %174 = arith.mulf %172, %173 : vector<16x32xf32>
    %175 = vector.broadcast %36 : vector<1x32xf32> to vector<16x32xf32>
    %176 = arith.addf %174, %175 : vector<16x32xf32>
    %177 = arith.truncf %176 : vector<16x32xf32> to vector<16x32xbf16>
    %c0_66 = arith.constant 0 : index
    %c0_67 = arith.constant 0 : index
    %c0_68 = arith.constant 0 : index
    %178 = vector.load %arg4[%c0_66, %c0_67, %c0_68] : memref<2x32x64xbf16, #tpu.memory_space<vmem>>, vector<1x32x64xbf16>
    %179 = vector.shape_cast %178 : vector<1x32x64xbf16> to vector<32x64xbf16>
    %cst_69 = arith.constant dense<0.000000e+00> : vector<16x64xf32>
    %180 = tpu.matmul %177, %179, %cst_69 {dimension_numbers = #tpu.dot_dimension_numbers<[1], [0], [0], [1], [0, 0, 1, 1], [], []>} : vector<16x32xbf16>, vector<32x64xbf16>, vector<16x64xf32> -> vector<16x64xf32>
    %181 = vector.broadcast %38 : vector<1x64xf32> to vector<16x64xf32>
    %182 = arith.addf %180, %181 : vector<16x64xf32>
    %183 = arith.mulf %182, %182 : vector<16x64xf32>
    %184 = arith.mulf %182, %183 : vector<16x64xf32>
    %cst_70 = arith.constant 4.471500e-02 : f32
    %185 = vector.broadcast %cst_70 : f32 to vector<16x64xf32>
    %186 = arith.mulf %185, %184 : vector<16x64xf32>
    %187 = arith.addf %182, %186 : vector<16x64xf32>
    %cst_71 = arith.constant 0.797884583 : f32
    %188 = vector.broadcast %cst_71 : f32 to vector<16x64xf32>
    %189 = arith.mulf %188, %187 : vector<16x64xf32>
    %190 = math.tanh %189 : vector<16x64xf32>
    %cst_72 = arith.constant 1.000000e+00 : f32
    %191 = vector.broadcast %cst_72 : f32 to vector<16x64xf32>
    %192 = arith.addf %191, %190 : vector<16x64xf32>
    %cst_73 = arith.constant 5.000000e-01 : f32
    %193 = vector.broadcast %cst_73 : f32 to vector<16x64xf32>
    %194 = arith.mulf %193, %192 : vector<16x64xf32>
    %195 = arith.mulf %182, %194 : vector<16x64xf32>
    %196 = arith.truncf %195 : vector<16x64xf32> to vector<16x64xbf16>
    %c0_74 = arith.constant 0 : index
    %c0_75 = arith.constant 0 : index
    %c0_76 = arith.constant 0 : index
    %197 = vector.load %arg5[%c0_74, %c0_75, %c0_76] : memref<2x64x32xbf16, #tpu.memory_space<vmem>>, vector<1x64x32xbf16>
    %198 = vector.shape_cast %197 : vector<1x64x32xbf16> to vector<64x32xbf16>
    %cst_77 = arith.constant dense<0.000000e+00> : vector<16x32xf32>
    %199 = tpu.matmul %196, %198, %cst_77 {dimension_numbers = #tpu.dot_dimension_numbers<[1], [0], [0], [1], [0, 0, 1, 1], [], []>} : vector<16x64xbf16>, vector<64x32xbf16>, vector<16x32xf32> -> vector<16x32xf32>
    %200 = vector.broadcast %40 : vector<1x32xf32> to vector<16x32xf32>
    %201 = arith.addf %199, %200 : vector<16x32xf32>
    %202 = arith.addf %176, %201 : vector<16x32xf32>
    %cst_78 = arith.constant dense<0.000000e+00> : vector<16xf32>
    %203 = vector.multi_reduction <add>, %202, %cst_78 [1] : vector<16x32xf32> to vector<16xf32>
    %204 = vector.shape_cast %203 : vector<16xf32> to vector<16x1xf32>
    %cst_79 = arith.constant 3.200000e+01 : f32
    %205 = vector.broadcast %cst_79 : f32 to vector<16x1xf32>
    %206 = arith.divf %204, %205 : vector<16x1xf32>
    %207 = arith.mulf %202, %202 : vector<16x32xf32>
    %cst_80 = arith.constant dense<0.000000e+00> : vector<16xf32>
    %208 = vector.multi_reduction <add>, %207, %cst_80 [1] : vector<16x32xf32> to vector<16xf32>
    %209 = vector.shape_cast %208 : vector<16xf32> to vector<16x1xf32>
    %cst_81 = arith.constant 3.200000e+01 : f32
    %210 = vector.broadcast %cst_81 : f32 to vector<16x1xf32>
    %211 = arith.divf %209, %210 : vector<16x1xf32>
    %212 = arith.mulf %206, %206 : vector<16x1xf32>
    %213 = arith.subf %211, %212 : vector<16x1xf32>
    %214 = vector.broadcast %206 : vector<16x1xf32> to vector<16x32xf32>
    %215 = arith.subf %202, %214 : vector<16x32xf32>
    %cst_82 = arith.constant 9.99999996E-13 : f32
    %216 = vector.broadcast %cst_82 : f32 to vector<16x1xf32>
    %217 = arith.addf %213, %216 : vector<16x1xf32>
    %218 = math.rsqrt %217 : vector<16x1xf32>
    %219 = vector.broadcast %218 : vector<16x1xf32> to vector<16x32xf32>
    %220 = arith.mulf %215, %219 : vector<16x32xf32>
    %221 = vector.broadcast %42 : vector<1x32xf32> to vector<16x32xf32>
    %222 = arith.mulf %220, %221 : vector<16x32xf32>
    %223 = vector.broadcast %44 : vector<1x32xf32> to vector<16x32xf32>
    %224 = arith.addf %222, %223 : vector<16x32xf32>
    %c1_83 = arith.constant 1 : index
    %c0_84 = arith.constant 0 : index
    %c0_85 = arith.constant 0 : index
    %225 = vector.load %arg6[%c1_83, %c0_84, %c0_85] : memref<2x8x128xf32, #tpu.memory_space<vmem>>, vector<1x1x96xf32>
    %226 = vector.shape_cast %225 : vector<1x1x96xf32> to vector<1x96xf32>
    %c1_86 = arith.constant 1 : index
    %c1_87 = arith.constant 1 : index
    %c0_88 = arith.constant 0 : index
    %227 = vector.load %arg6[%c1_86, %c1_87, %c0_88] : memref<2x8x128xf32, #tpu.memory_space<vmem>>, vector<1x1x32xf32>
    %228 = vector.shape_cast %227 : vector<1x1x32xf32> to vector<1x32xf32>
    %c1_89 = arith.constant 1 : index
    %c2_90 = arith.constant 2 : index
    %c0_91 = arith.constant 0 : index
    %229 = vector.load %arg6[%c1_89, %c2_90, %c0_91] : memref<2x8x128xf32, #tpu.memory_space<vmem>>, vector<1x1x32xf32>
    %230 = vector.shape_cast %229 : vector<1x1x32xf32> to vector<1x32xf32>
    %c1_92 = arith.constant 1 : index
    %c3_93 = arith.constant 3 : index
    %c0_94 = arith.constant 0 : index
    %231 = vector.load %arg6[%c1_92, %c3_93, %c0_94] : memref<2x8x128xf32, #tpu.memory_space<vmem>>, vector<1x1x32xf32>
    %232 = vector.shape_cast %231 : vector<1x1x32xf32> to vector<1x32xf32>
    %c1_95 = arith.constant 1 : index
    %c4_96 = arith.constant 4 : index
    %c0_97 = arith.constant 0 : index
    %233 = vector.load %arg6[%c1_95, %c4_96, %c0_97] : memref<2x8x128xf32, #tpu.memory_space<vmem>>, vector<1x1x64xf32>
    %234 = vector.shape_cast %233 : vector<1x1x64xf32> to vector<1x64xf32>
    %c1_98 = arith.constant 1 : index
    %c5_99 = arith.constant 5 : index
    %c0_100 = arith.constant 0 : index
    %235 = vector.load %arg6[%c1_98, %c5_99, %c0_100] : memref<2x8x128xf32, #tpu.memory_space<vmem>>, vector<1x1x32xf32>
    %236 = vector.shape_cast %235 : vector<1x1x32xf32> to vector<1x32xf32>
    %c1_101 = arith.constant 1 : index
    %c6_102 = arith.constant 6 : index
    %c0_103 = arith.constant 0 : index
    %237 = vector.load %arg6[%c1_101, %c6_102, %c0_103] : memref<2x8x128xf32, #tpu.memory_space<vmem>>, vector<1x1x32xf32>
    %238 = vector.shape_cast %237 : vector<1x1x32xf32> to vector<1x32xf32>
    %c1_104 = arith.constant 1 : index
    %c7_105 = arith.constant 7 : index
    %c0_106 = arith.constant 0 : index
    %239 = vector.load %arg6[%c1_104, %c7_105, %c0_106] : memref<2x8x128xf32, #tpu.memory_space<vmem>>, vector<1x1x32xf32>
    %240 = vector.shape_cast %239 : vector<1x1x32xf32> to vector<1x32xf32>
    %241 = arith.truncf %224 : vector<16x32xf32> to vector<16x32xbf16>
    %c1_107 = arith.constant 1 : index
    %c0_108 = arith.constant 0 : index
    %c0_109 = arith.constant 0 : index
    %242 = vector.load %arg3[%c1_107, %c0_108, %c0_109] : memref<2x64x96xbf16, #tpu.memory_space<vmem>>, vector<1x32x96xbf16>
    %243 = vector.shape_cast %242 : vector<1x32x96xbf16> to vector<32x96xbf16>
    %cst_110 = arith.constant dense<0.000000e+00> : vector<16x96xf32>
    %244 = tpu.matmul %241, %243, %cst_110 {dimension_numbers = #tpu.dot_dimension_numbers<[1], [0], [0], [1], [0, 0, 1, 1], [], []>} : vector<16x32xbf16>, vector<32x96xbf16>, vector<16x96xf32> -> vector<16x96xf32>
    %245 = vector.broadcast %226 : vector<1x96xf32> to vector<16x96xf32>
    %246 = arith.addf %244, %245 : vector<16x96xf32>
    %cst_111 = arith.constant 0.000000e+00 : f32
    %247 = vector.broadcast %cst_111 : f32 to vector<16x32xf32>
    %248 = vector.extract_strided_slice %246 {offsets = [0, 0], sizes = [16, 8], strides = [1, 1]} : vector<16x96xf32> to vector<16x8xf32>
    %249 = vector.shape_cast %248 : vector<16x8xf32> to vector<2x8x8xf32>
    %250 = vector.extract_strided_slice %246 {offsets = [0, 32], sizes = [16, 8], strides = [1, 1]} : vector<16x96xf32> to vector<16x8xf32>
    %251 = vector.shape_cast %250 : vector<16x8xf32> to vector<2x8x8xf32>
    %252 = vector.extract_strided_slice %246 {offsets = [0, 64], sizes = [16, 8], strides = [1, 1]} : vector<16x96xf32> to vector<16x8xf32>
    %253 = vector.shape_cast %252 : vector<16x8xf32> to vector<2x8x8xf32>
    "tpu.trace_start"() <{level = 10 : i32, message = "bqd,bkd->bqk"}> : () -> ()
    %cst_112 = arith.constant dense<0.000000e+00> : vector<2x8x8xf32>
    %254 = tpu.matmul %249, %251, %cst_112 {dimension_numbers = #tpu.dot_dimension_numbers<[2], [2], [1], [1], [0, 0, 0, 1, 1, 1], [0], [0]>} : vector<2x8x8xf32>, vector<2x8x8xf32>, vector<2x8x8xf32> -> vector<2x8x8xf32>
    "tpu.trace_stop"() : () -> ()
    %255 = arith.addf %254, %28 : vector<2x8x8xf32>
    %cst_113 = arith.constant dense<0xFF800000> : vector<2x8xf32>
    %256 = vector.multi_reduction <maximumf>, %255, %cst_113 [2] : vector<2x8x8xf32> to vector<2x8xf32>
    %257 = vector.shape_cast %256 : vector<2x8xf32> to vector<2x8x1xf32>
    %258 = vector.broadcast %257 : vector<2x8x1xf32> to vector<2x8x8xf32>
    %259 = arith.subf %255, %258 : vector<2x8x8xf32>
    %260 = math.exp %259 : vector<2x8x8xf32>
    %cst_114 = arith.constant dense<0.000000e+00> : vector<2x8xf32>
    %261 = vector.multi_reduction <add>, %260, %cst_114 [2] : vector<2x8x8xf32> to vector<2x8xf32>
    %262 = vector.shape_cast %261 : vector<2x8xf32> to vector<2x8x1xf32>
    %263 = tpu.reciprocal %262 {approx = true} : vector<2x8x1xf32> -> vector<2x8x1xf32>
    %264 = vector.broadcast %263 : vector<2x8x1xf32> to vector<2x8x8xf32>
    %265 = arith.mulf %260, %264 : vector<2x8x8xf32>
    "tpu.trace_start"() <{level = 10 : i32, message = "bqk,bkd->bqd"}> : () -> ()
    %cst_115 = arith.constant dense<0.000000e+00> : vector<2x8x8xf32>
    %266 = tpu.matmul %265, %253, %cst_115 {dimension_numbers = #tpu.dot_dimension_numbers<[2], [1], [1], [2], [0, 0, 0, 1, 1, 2], [0], [0]>} : vector<2x8x8xf32>, vector<2x8x8xf32>, vector<2x8x8xf32> -> vector<2x8x8xf32>
    "tpu.trace_stop"() : () -> ()
    %c1_116 = arith.constant 1 : index
    %c32_117 = arith.constant 32 : index
    %c0_118 = arith.constant 0 : index
    %267 = vector.load %arg3[%c1_116, %c32_117, %c0_118] : memref<2x64x96xbf16, #tpu.memory_space<vmem>>, vector<1x8x32xbf16>
    %268 = vector.shape_cast %267 : vector<1x8x32xbf16> to vector<8x32xbf16>
    %269 = vector.shape_cast %266 : vector<2x8x8xf32> to vector<16x8xf32>
    %270 = arith.truncf %269 : vector<16x8xf32> to vector<16x8xbf16>
    %cst_119 = arith.constant dense<0.000000e+00> : vector<16x32xf32>
    %271 = tpu.matmul %270, %268, %cst_119 {dimension_numbers = #tpu.dot_dimension_numbers<[1], [0], [0], [1], [0, 0, 1, 1], [], []>} : vector<16x8xbf16>, vector<8x32xbf16>, vector<16x32xf32> -> vector<16x32xf32>
    %272 = arith.addf %247, %271 : vector<16x32xf32>
    %273 = vector.extract_strided_slice %246 {offsets = [0, 8], sizes = [16, 8], strides = [1, 1]} : vector<16x96xf32> to vector<16x8xf32>
    %274 = vector.shape_cast %273 : vector<16x8xf32> to vector<2x8x8xf32>
    %275 = vector.extract_strided_slice %246 {offsets = [0, 40], sizes = [16, 8], strides = [1, 1]} : vector<16x96xf32> to vector<16x8xf32>
    %276 = vector.shape_cast %275 : vector<16x8xf32> to vector<2x8x8xf32>
    %277 = vector.extract_strided_slice %246 {offsets = [0, 72], sizes = [16, 8], strides = [1, 1]} : vector<16x96xf32> to vector<16x8xf32>
    %278 = vector.shape_cast %277 : vector<16x8xf32> to vector<2x8x8xf32>
    "tpu.trace_start"() <{level = 10 : i32, message = "bqd,bkd->bqk"}> : () -> ()
    %cst_120 = arith.constant dense<0.000000e+00> : vector<2x8x8xf32>
    %279 = tpu.matmul %274, %276, %cst_120 {dimension_numbers = #tpu.dot_dimension_numbers<[2], [2], [1], [1], [0, 0, 0, 1, 1, 1], [0], [0]>} : vector<2x8x8xf32>, vector<2x8x8xf32>, vector<2x8x8xf32> -> vector<2x8x8xf32>
    "tpu.trace_stop"() : () -> ()
    %280 = arith.addf %279, %28 : vector<2x8x8xf32>
    %cst_121 = arith.constant dense<0xFF800000> : vector<2x8xf32>
    %281 = vector.multi_reduction <maximumf>, %280, %cst_121 [2] : vector<2x8x8xf32> to vector<2x8xf32>
    %282 = vector.shape_cast %281 : vector<2x8xf32> to vector<2x8x1xf32>
    %283 = vector.broadcast %282 : vector<2x8x1xf32> to vector<2x8x8xf32>
    %284 = arith.subf %280, %283 : vector<2x8x8xf32>
    %285 = math.exp %284 : vector<2x8x8xf32>
    %cst_122 = arith.constant dense<0.000000e+00> : vector<2x8xf32>
    %286 = vector.multi_reduction <add>, %285, %cst_122 [2] : vector<2x8x8xf32> to vector<2x8xf32>
    %287 = vector.shape_cast %286 : vector<2x8xf32> to vector<2x8x1xf32>
    %288 = tpu.reciprocal %287 {approx = true} : vector<2x8x1xf32> -> vector<2x8x1xf32>
    %289 = vector.broadcast %288 : vector<2x8x1xf32> to vector<2x8x8xf32>
    %290 = arith.mulf %285, %289 : vector<2x8x8xf32>
    "tpu.trace_start"() <{level = 10 : i32, message = "bqk,bkd->bqd"}> : () -> ()
    %cst_123 = arith.constant dense<0.000000e+00> : vector<2x8x8xf32>
    %291 = tpu.matmul %290, %278, %cst_123 {dimension_numbers = #tpu.dot_dimension_numbers<[2], [1], [1], [2], [0, 0, 0, 1, 1, 2], [0], [0]>} : vector<2x8x8xf32>, vector<2x8x8xf32>, vector<2x8x8xf32> -> vector<2x8x8xf32>
    "tpu.trace_stop"() : () -> ()
    %c1_124 = arith.constant 1 : index
    %c40_125 = arith.constant 40 : index
    %c0_126 = arith.constant 0 : index
    %292 = vector.load %arg3[%c1_124, %c40_125, %c0_126] : memref<2x64x96xbf16, #tpu.memory_space<vmem>>, vector<1x8x32xbf16>
    %293 = vector.shape_cast %292 : vector<1x8x32xbf16> to vector<8x32xbf16>
    %294 = vector.shape_cast %291 : vector<2x8x8xf32> to vector<16x8xf32>
    %295 = arith.truncf %294 : vector<16x8xf32> to vector<16x8xbf16>
    %cst_127 = arith.constant dense<0.000000e+00> : vector<16x32xf32>
    %296 = tpu.matmul %295, %293, %cst_127 {dimension_numbers = #tpu.dot_dimension_numbers<[1], [0], [0], [1], [0, 0, 1, 1], [], []>} : vector<16x8xbf16>, vector<8x32xbf16>, vector<16x32xf32> -> vector<16x32xf32>
    %297 = arith.addf %272, %296 : vector<16x32xf32>
    %298 = vector.extract_strided_slice %246 {offsets = [0, 16], sizes = [16, 8], strides = [1, 1]} : vector<16x96xf32> to vector<16x8xf32>
    %299 = vector.shape_cast %298 : vector<16x8xf32> to vector<2x8x8xf32>
    %300 = vector.extract_strided_slice %246 {offsets = [0, 48], sizes = [16, 8], strides = [1, 1]} : vector<16x96xf32> to vector<16x8xf32>
    %301 = vector.shape_cast %300 : vector<16x8xf32> to vector<2x8x8xf32>
    %302 = vector.extract_strided_slice %246 {offsets = [0, 80], sizes = [16, 8], strides = [1, 1]} : vector<16x96xf32> to vector<16x8xf32>
    %303 = vector.shape_cast %302 : vector<16x8xf32> to vector<2x8x8xf32>
    "tpu.trace_start"() <{level = 10 : i32, message = "bqd,bkd->bqk"}> : () -> ()
    %cst_128 = arith.constant dense<0.000000e+00> : vector<2x8x8xf32>
    %304 = tpu.matmul %299, %301, %cst_128 {dimension_numbers = #tpu.dot_dimension_numbers<[2], [2], [1], [1], [0, 0, 0, 1, 1, 1], [0], [0]>} : vector<2x8x8xf32>, vector<2x8x8xf32>, vector<2x8x8xf32> -> vector<2x8x8xf32>
    "tpu.trace_stop"() : () -> ()
    %305 = arith.addf %304, %28 : vector<2x8x8xf32>
    %cst_129 = arith.constant dense<0xFF800000> : vector<2x8xf32>
    %306 = vector.multi_reduction <maximumf>, %305, %cst_129 [2] : vector<2x8x8xf32> to vector<2x8xf32>
    %307 = vector.shape_cast %306 : vector<2x8xf32> to vector<2x8x1xf32>
    %308 = vector.broadcast %307 : vector<2x8x1xf32> to vector<2x8x8xf32>
    %309 = arith.subf %305, %308 : vector<2x8x8xf32>
    %310 = math.exp %309 : vector<2x8x8xf32>
    %cst_130 = arith.constant dense<0.000000e+00> : vector<2x8xf32>
    %311 = vector.multi_reduction <add>, %310, %cst_130 [2] : vector<2x8x8xf32> to vector<2x8xf32>
    %312 = vector.shape_cast %311 : vector<2x8xf32> to vector<2x8x1xf32>
    %313 = tpu.reciprocal %312 {approx = true} : vector<2x8x1xf32> -> vector<2x8x1xf32>
    %314 = vector.broadcast %313 : vector<2x8x1xf32> to vector<2x8x8xf32>
    %315 = arith.mulf %310, %314 : vector<2x8x8xf32>
    "tpu.trace_start"() <{level = 10 : i32, message = "bqk,bkd->bqd"}> : () -> ()
    %cst_131 = arith.constant dense<0.000000e+00> : vector<2x8x8xf32>
    %316 = tpu.matmul %315, %303, %cst_131 {dimension_numbers = #tpu.dot_dimension_numbers<[2], [1], [1], [2], [0, 0, 0, 1, 1, 2], [0], [0]>} : vector<2x8x8xf32>, vector<2x8x8xf32>, vector<2x8x8xf32> -> vector<2x8x8xf32>
    "tpu.trace_stop"() : () -> ()
    %c1_132 = arith.constant 1 : index
    %c48_133 = arith.constant 48 : index
    %c0_134 = arith.constant 0 : index
    %317 = vector.load %arg3[%c1_132, %c48_133, %c0_134] : memref<2x64x96xbf16, #tpu.memory_space<vmem>>, vector<1x8x32xbf16>
    %318 = vector.shape_cast %317 : vector<1x8x32xbf16> to vector<8x32xbf16>
    %319 = vector.shape_cast %316 : vector<2x8x8xf32> to vector<16x8xf32>
    %320 = arith.truncf %319 : vector<16x8xf32> to vector<16x8xbf16>
    %cst_135 = arith.constant dense<0.000000e+00> : vector<16x32xf32>
    %321 = tpu.matmul %320, %318, %cst_135 {dimension_numbers = #tpu.dot_dimension_numbers<[1], [0], [0], [1], [0, 0, 1, 1], [], []>} : vector<16x8xbf16>, vector<8x32xbf16>, vector<16x32xf32> -> vector<16x32xf32>
    %322 = arith.addf %297, %321 : vector<16x32xf32>
    %323 = vector.extract_strided_slice %246 {offsets = [0, 24], sizes = [16, 8], strides = [1, 1]} : vector<16x96xf32> to vector<16x8xf32>
    %324 = vector.shape_cast %323 : vector<16x8xf32> to vector<2x8x8xf32>
    %325 = vector.extract_strided_slice %246 {offsets = [0, 56], sizes = [16, 8], strides = [1, 1]} : vector<16x96xf32> to vector<16x8xf32>
    %326 = vector.shape_cast %325 : vector<16x8xf32> to vector<2x8x8xf32>
    %327 = vector.extract_strided_slice %246 {offsets = [0, 88], sizes = [16, 8], strides = [1, 1]} : vector<16x96xf32> to vector<16x8xf32>
    %328 = vector.shape_cast %327 : vector<16x8xf32> to vector<2x8x8xf32>
    "tpu.trace_start"() <{level = 10 : i32, message = "bqd,bkd->bqk"}> : () -> ()
    %cst_136 = arith.constant dense<0.000000e+00> : vector<2x8x8xf32>
    %329 = tpu.matmul %324, %326, %cst_136 {dimension_numbers = #tpu.dot_dimension_numbers<[2], [2], [1], [1], [0, 0, 0, 1, 1, 1], [0], [0]>} : vector<2x8x8xf32>, vector<2x8x8xf32>, vector<2x8x8xf32> -> vector<2x8x8xf32>
    "tpu.trace_stop"() : () -> ()
    %330 = arith.addf %329, %28 : vector<2x8x8xf32>
    %cst_137 = arith.constant dense<0xFF800000> : vector<2x8xf32>
    %331 = vector.multi_reduction <maximumf>, %330, %cst_137 [2] : vector<2x8x8xf32> to vector<2x8xf32>
    %332 = vector.shape_cast %331 : vector<2x8xf32> to vector<2x8x1xf32>
    %333 = vector.broadcast %332 : vector<2x8x1xf32> to vector<2x8x8xf32>
    %334 = arith.subf %330, %333 : vector<2x8x8xf32>
    %335 = math.exp %334 : vector<2x8x8xf32>
    %cst_138 = arith.constant dense<0.000000e+00> : vector<2x8xf32>
    %336 = vector.multi_reduction <add>, %335, %cst_138 [2] : vector<2x8x8xf32> to vector<2x8xf32>
    %337 = vector.shape_cast %336 : vector<2x8xf32> to vector<2x8x1xf32>
    %338 = tpu.reciprocal %337 {approx = true} : vector<2x8x1xf32> -> vector<2x8x1xf32>
    %339 = vector.broadcast %338 : vector<2x8x1xf32> to vector<2x8x8xf32>
    %340 = arith.mulf %335, %339 : vector<2x8x8xf32>
    "tpu.trace_start"() <{level = 10 : i32, message = "bqk,bkd->bqd"}> : () -> ()
    %cst_139 = arith.constant dense<0.000000e+00> : vector<2x8x8xf32>
    %341 = tpu.matmul %340, %328, %cst_139 {dimension_numbers = #tpu.dot_dimension_numbers<[2], [1], [1], [2], [0, 0, 0, 1, 1, 2], [0], [0]>} : vector<2x8x8xf32>, vector<2x8x8xf32>, vector<2x8x8xf32> -> vector<2x8x8xf32>
    "tpu.trace_stop"() : () -> ()
    %c1_140 = arith.constant 1 : index
    %c56_141 = arith.constant 56 : index
    %c0_142 = arith.constant 0 : index
    %342 = vector.load %arg3[%c1_140, %c56_141, %c0_142] : memref<2x64x96xbf16, #tpu.memory_space<vmem>>, vector<1x8x32xbf16>
    %343 = vector.shape_cast %342 : vector<1x8x32xbf16> to vector<8x32xbf16>
    %344 = vector.shape_cast %341 : vector<2x8x8xf32> to vector<16x8xf32>
    %345 = arith.truncf %344 : vector<16x8xf32> to vector<16x8xbf16>
    %cst_143 = arith.constant dense<0.000000e+00> : vector<16x32xf32>
    %346 = tpu.matmul %345, %343, %cst_143 {dimension_numbers = #tpu.dot_dimension_numbers<[1], [0], [0], [1], [0, 0, 1, 1], [], []>} : vector<16x8xbf16>, vector<8x32xbf16>, vector<16x32xf32> -> vector<16x32xf32>
    %347 = arith.addf %322, %346 : vector<16x32xf32>
    %348 = arith.addf %224, %347 : vector<16x32xf32>
    %349 = vector.broadcast %228 : vector<1x32xf32> to vector<16x32xf32>
    %350 = arith.addf %348, %349 : vector<16x32xf32>
    %cst_144 = arith.constant dense<0.000000e+00> : vector<16xf32>
    %351 = vector.multi_reduction <add>, %350, %cst_144 [1] : vector<16x32xf32> to vector<16xf32>
    %352 = vector.shape_cast %351 : vector<16xf32> to vector<16x1xf32>
    %cst_145 = arith.constant 3.200000e+01 : f32
    %353 = vector.broadcast %cst_145 : f32 to vector<16x1xf32>
    %354 = arith.divf %352, %353 : vector<16x1xf32>
    %355 = arith.mulf %350, %350 : vector<16x32xf32>
    %cst_146 = arith.constant dense<0.000000e+00> : vector<16xf32>
    %356 = vector.multi_reduction <add>, %355, %cst_146 [1] : vector<16x32xf32> to vector<16xf32>
    %357 = vector.shape_cast %356 : vector<16xf32> to vector<16x1xf32>
    %cst_147 = arith.constant 3.200000e+01 : f32
    %358 = vector.broadcast %cst_147 : f32 to vector<16x1xf32>
    %359 = arith.divf %357, %358 : vector<16x1xf32>
    %360 = arith.mulf %354, %354 : vector<16x1xf32>
    %361 = arith.subf %359, %360 : vector<16x1xf32>
    %362 = vector.broadcast %354 : vector<16x1xf32> to vector<16x32xf32>
    %363 = arith.subf %350, %362 : vector<16x32xf32>
    %cst_148 = arith.constant 9.99999996E-13 : f32
    %364 = vector.broadcast %cst_148 : f32 to vector<16x1xf32>
    %365 = arith.addf %361, %364 : vector<16x1xf32>
    %366 = math.rsqrt %365 : vector<16x1xf32>
    %367 = vector.broadcast %366 : vector<16x1xf32> to vector<16x32xf32>
    %368 = arith.mulf %363, %367 : vector<16x32xf32>
    %369 = vector.broadcast %230 : vector<1x32xf32> to vector<16x32xf32>
    %370 = arith.mulf %368, %369 : vector<16x32xf32>
    %371 = vector.broadcast %232 : vector<1x32xf32> to vector<16x32xf32>
    %372 = arith.addf %370, %371 : vector<16x32xf32>
    %373 = arith.truncf %372 : vector<16x32xf32> to vector<16x32xbf16>
    %c1_149 = arith.constant 1 : index
    %c0_150 = arith.constant 0 : index
    %c0_151 = arith.constant 0 : index
    %374 = vector.load %arg4[%c1_149, %c0_150, %c0_151] : memref<2x32x64xbf16, #tpu.memory_space<vmem>>, vector<1x32x64xbf16>
    %375 = vector.shape_cast %374 : vector<1x32x64xbf16> to vector<32x64xbf16>
    %cst_152 = arith.constant dense<0.000000e+00> : vector<16x64xf32>
    %376 = tpu.matmul %373, %375, %cst_152 {dimension_numbers = #tpu.dot_dimension_numbers<[1], [0], [0], [1], [0, 0, 1, 1], [], []>} : vector<16x32xbf16>, vector<32x64xbf16>, vector<16x64xf32> -> vector<16x64xf32>
    %377 = vector.broadcast %234 : vector<1x64xf32> to vector<16x64xf32>
    %378 = arith.addf %376, %377 : vector<16x64xf32>
    %379 = arith.mulf %378, %378 : vector<16x64xf32>
    %380 = arith.mulf %378, %379 : vector<16x64xf32>
    %cst_153 = arith.constant 4.471500e-02 : f32
    %381 = vector.broadcast %cst_153 : f32 to vector<16x64xf32>
    %382 = arith.mulf %381, %380 : vector<16x64xf32>
    %383 = arith.addf %378, %382 : vector<16x64xf32>
    %cst_154 = arith.constant 0.797884583 : f32
    %384 = vector.broadcast %cst_154 : f32 to vector<16x64xf32>
    %385 = arith.mulf %384, %383 : vector<16x64xf32>
    %386 = math.tanh %385 : vector<16x64xf32>
    %cst_155 = arith.constant 1.000000e+00 : f32
    %387 = vector.broadcast %cst_155 : f32 to vector<16x64xf32>
    %388 = arith.addf %387, %386 : vector<16x64xf32>
    %cst_156 = arith.constant 5.000000e-01 : f32
    %389 = vector.broadcast %cst_156 : f32 to vector<16x64xf32>
    %390 = arith.mulf %389, %388 : vector<16x64xf32>
    %391 = arith.mulf %378, %390 : vector<16x64xf32>
    %392 = arith.truncf %391 : vector<16x64xf32> to vector<16x64xbf16>
    %c1_157 = arith.constant 1 : index
    %c0_158 = arith.constant 0 : index
    %c0_159 = arith.constant 0 : index
    %393 = vector.load %arg5[%c1_157, %c0_158, %c0_159] : memref<2x64x32xbf16, #tpu.memory_space<vmem>>, vector<1x64x32xbf16>
    %394 = vector.shape_cast %393 : vector<1x64x32xbf16> to vector<64x32xbf16>
    %cst_160 = arith.constant dense<0.000000e+00> : vector<16x32xf32>
    %395 = tpu.matmul %392, %394, %cst_160 {dimension_numbers = #tpu.dot_dimension_numbers<[1], [0], [0], [1], [0, 0, 1, 1], [], []>} : vector<16x64xbf16>, vector<64x32xbf16>, vector<16x32xf32> -> vector<16x32xf32>
    %396 = vector.broadcast %236 : vector<1x32xf32> to vector<16x32xf32>
    %397 = arith.addf %395, %396 : vector<16x32xf32>
    %398 = arith.addf %372, %397 : vector<16x32xf32>
    %cst_161 = arith.constant dense<0.000000e+00> : vector<16xf32>
    %399 = vector.multi_reduction <add>, %398, %cst_161 [1] : vector<16x32xf32> to vector<16xf32>
    %400 = vector.shape_cast %399 : vector<16xf32> to vector<16x1xf32>
    %cst_162 = arith.constant 3.200000e+01 : f32
    %401 = vector.broadcast %cst_162 : f32 to vector<16x1xf32>
    %402 = arith.divf %400, %401 : vector<16x1xf32>
    %403 = arith.mulf %398, %398 : vector<16x32xf32>
    %cst_163 = arith.constant dense<0.000000e+00> : vector<16xf32>
    %404 = vector.multi_reduction <add>, %403, %cst_163 [1] : vector<16x32xf32> to vector<16xf32>
    %405 = vector.shape_cast %404 : vector<16xf32> to vector<16x1xf32>
    %cst_164 = arith.constant 3.200000e+01 : f32
    %406 = vector.broadcast %cst_164 : f32 to vector<16x1xf32>
    %407 = arith.divf %405, %406 : vector<16x1xf32>
    %408 = arith.mulf %402, %402 : vector<16x1xf32>
    %409 = arith.subf %407, %408 : vector<16x1xf32>
    %410 = vector.broadcast %402 : vector<16x1xf32> to vector<16x32xf32>
    %411 = arith.subf %398, %410 : vector<16x32xf32>
    %cst_165 = arith.constant 9.99999996E-13 : f32
    %412 = vector.broadcast %cst_165 : f32 to vector<16x1xf32>
    %413 = arith.addf %409, %412 : vector<16x1xf32>
    %414 = math.rsqrt %413 : vector<16x1xf32>
    %415 = vector.broadcast %414 : vector<16x1xf32> to vector<16x32xf32>
    %416 = arith.mulf %411, %415 : vector<16x32xf32>
    %417 = vector.broadcast %238 : vector<1x32xf32> to vector<16x32xf32>
    %418 = arith.mulf %416, %417 : vector<16x32xf32>
    %419 = vector.broadcast %240 : vector<1x32xf32> to vector<16x32xf32>
    %420 = arith.addf %418, %419 : vector<16x32xf32>
    %421 = vector.shape_cast %420 : vector<16x32xf32> to vector<2x8x32xf32>
    %cst_166 = arith.constant dense<0.000000e+00> : vector<2x32xf32>
    %422 = vector.multi_reduction <add>, %421, %cst_166 [1] : vector<2x8x32xf32> to vector<2x32xf32>
    %423 = arith.truncf %422 : vector<2x32xf32> to vector<2x32xbf16>
    %c0_167 = arith.constant 0 : index
    %c0_168 = arith.constant 0 : index
    %424 = vector.load %arg7[%c0_167, %c0_168] : memref<32x128xbf16, #tpu.memory_space<vmem>>, vector<32x128xbf16>
    %cst_169 = arith.constant dense<0.000000e+00> : vector<2x128xf32>
    %425 = tpu.matmul %423, %424, %cst_169 {dimension_numbers = #tpu.dot_dimension_numbers<[1], [0], [0], [1], [0, 0, 1, 1], [], []>} : vector<2x32xbf16>, vector<32x128xbf16>, vector<2x128xf32> -> vector<2x128xf32>
    %c2_170 = arith.constant 2 : index
    %c0_171 = arith.constant 0 : index
    %426 = vector.load %arg2[%c2_170, %c0_171] : memref<8x128xf32, #tpu.memory_space<vmem>>, vector<1x128xf32>
    %427 = vector.broadcast %426 : vector<1x128xf32> to vector<2x128xf32>
    %428 = arith.addf %425, %427 : vector<2x128xf32>
    %c0_172 = arith.constant 0 : index
    %c0_173 = arith.constant 0 : index
    %429 = vector.load %arg8[%c0_172, %c0_173] : memref<2x128xf32, #tpu.memory_space<vmem>>, vector<2x128xf32>
    tpu.vector_store %arg8[%c0_172, %c0_173], %428 {strides = array<i32>} : memref<2x128xf32, #tpu.memory_space<vmem>>, vector<2x128xf32>,
    return
  }
}

</mosaic_0001>

<bundles_post_ra>
// kernel: base_model_nlp_forward.1
= control target key start
LH: loop header
LB: loop body
LE: loop exit
PB: predicated region body
PF: predicated region fallthrough
CT: control target
= control target key end

     0   :  { %vm34_vm0 = vcmask 261120   ;;  %v4539_v8 = vmov 0.0   ;;  %vm4540_vm1 = vmmov 0   ;;  %s4541_s18 = smov 96   ;;  %vm188_vm2 = vcmask 64512   ;;  %s4544_s21 = smov 88   ;;  %s5182_s0 = inlined_call_operand.vmem [shape: f32[16,32], index: 0, kind: input, shape index: {}]   ;;  %s5183_s3 = inlined_call_operand.vmem [shape: bf16[2,64,96], index: 3, kind: input, shape index: {}]   ;;  %s5184_s2 = inlined_call_operand.vmem [shape: f32[8,128], index: 2, kind: input, shape index: {}]   ;;  %s5185_s6 = inlined_call_operand.vmem [shape: f32[2,8,128], index: 6, kind: input, shape index: {}]   ;;  %s5186_s1 = inlined_call_operand.vmem [shape: f32[2,8], index: 1, kind: input, shape index: {}]   ;;  %s5187_s4 = inlined_call_operand.vmem [shape: bf16[2,32,64], index: 4, kind: input, shape index: {}]   ;;  %s5188_s5 = inlined_call_operand.vmem [shape: bf16[2,64,32], index: 5, kind: input, shape index: {}]   ;;  %s5189_s7 = inlined_call_operand.vmem [shape: bf16[32,128], index: 7, kind: input, shape index: {}]   ;;  %s5190_s8 = inlined_call_operand.vmem [shape: f32[2,128], index: 8, kind: output, shape index: {}]  }
   0x1   :  { %v30_v0 = vld [vmem:[%s5182_s0] sm:$0xff]  ;;  %v31_v1 = vld [vmem:[%s5182_s0 + $0x8] sm:$0xff]  ;;  %4143 = vmatprep.subr.bf16.mxu0 %v4539_v8  ;;  %4147 = vmatprep.mubr.msk.bf16.mxu0 %vm4540_vm1, %v4539_v8  ;;  %v4542_v47 = vmov 1966171168   ;;  %v91_v49 = vlaneseq  ;;  %s4545_s22 = smov 120   ;;  %s4546_s23 = smov 56  }
   0x2   :  { %v35_v2 = vsel %vm34_vm0, %v30_v0, 0.0  ;;  %v44_v3 = vmul.f32 %v30_v0, %v30_v0  ;;  %v45_v4 = vmul.f32 %v31_v1, %v31_v1  ;;  %v38_v6 = vsel %vm34_vm0, %v31_v1, 0.0  ;;  %v4429_v9 = vld [vmem:[%s5183_s3] sm:$0xff]   ;;  %4151 = vmatprep.subr.mxu1 %v4539_v8  ;;  %4153 = vmatprep.mubr.msk.f32.mxu1 %vm4540_vm1, %v4539_v8  ;;  %v4430_v10 = vld [vmem:[%s5183_s3 + $0x8] sm:$0xff]   ;;  %s4547_s24 = smov 80   ;;  %s4548_s25 = smov 112  }
   0x3   :  { %36 = vadd.xlane.f32.xlu0 %v35_v2  ;;  %4144 = vmatpush3.bf16.msra.mxu0 %v4429_v9  ;;  %v3909_v28 = vld [vmem:[%s5184_s2] ss:$0 sm:$0xff]  ;;  %v3910_v33 = vld [vmem:[%s5184_s2 + $0x1] ss:$0 sm:$0xff]  ;;  %v89_v48 = vunpack.c.l.s4 %v4542_v47  ;;  %v92_v51 = vshrl.u32 %v91_v49, 7  ;;  %s4549_s26 = smov 72  }
   0x4   :  { %v46_v5 = vsel %vm34_vm0, %v44_v3, 0.0  ;;  %v49_v7 = vsel %vm34_vm0, %v45_v4, 0.0  ;;  %4145 = vmatprep.subr.bf16.mxu0 %v4539_v8  ;;  %v3912_v38 = vld [vmem:[%s5185_s6] ss:$0 sm:$0xff]  ;;  %vm851_vm3 = vcmask 1043456   ;;  %s4550_s9 = smov 48  }
   0x5   :  { %47 = vadd.xlane.f32.xlu1 %v46_v5  ;;  %v90_v50 = vunpack.c.0.s8 %v89_v48  ;;  %v3911_v53 = vld.sshfl [vmem:[%s5186_s1] sm:$0x11 pattern:$0x75316420]  ;;  %v104_v55 = vsub.s32 0, %v92_v51  ;;  %s4543_s1 = smov 64  }
   0x6   :  { %v87_v56 = vcombine.high %v3911_v53, %v3911_v53  ;;  %s4551_s10 = smov 104   ;;  %s4552_s0 = smov 40   ;;  %vm1875_vm4 = vcmask 523264   ;;  %vm3846_vm5 = vcmask 1041409  }
   0x7   :  { %39 = vadd.xlane.f32.xlu0 %v38_v6  ;;  %4146 = vmatpush3.bf16.msra.mxu0 %v4430_v10  ;;  %v93_v52 = vsub.s32 %v90_v50, %v92_v51 }
   0x8   :  { %4166 = vmatprep.subr.mxu0 %v4539_v8 }
   0x9   :  { %50 = vadd.xlane.f32.xlu1 %v49_v7  ;;  %v94_v54 = vrot.slane %v3911_v53, %v93_v52  ;;  %v101_v58 = vrot.slane %v87_v56, %v93_v52 }
   0xb   :  { %v4663_v57 = vrot.slane %v94_v54, %v104_v55  ;;  %v4666_v62 = vrot.slane %v101_v58, %v104_v55 }
  0x90   :  { %v37_v11 = vpop.xlane.xlu0 %36 }
  0x91   :  { %v42_v12 = vmul.f32 0.03125, %v37_v11 }
  0x92   :  { %v48_v13 = vpop.xlane.xlu1 %47 }
  0x93   :  { %v54_v14 = vmul.f32 %v42_v12, %v42_v12  ;;  %v52_v15 = vmul.f32 0.03125, %v48_v13  ;;  %v58_v25 = vsub.f32 %v30_v0, %v42_v12 }
  0x94   :  { %v40_v16 = vpop.xlane.xlu0 %39 }
  0x95   :  { %v56_v17 = vsub.f32 %v52_v15, %v54_v14  ;;  %v43_v18 = vmul.f32 0.03125, %v40_v16 }
  0x96   :  { %v51_v19 = vpop.xlane.xlu1 %50 }
  0x97   :  { %v60_v20 = vadd.f32 1e-12, %v56_v17  ;;  %v55_v21 = vmul.f32 %v43_v18, %v43_v18  ;;  %v53_v22 = vmul.f32 0.03125, %v51_v19  ;;  %v59_v29 = vsub.f32 %v31_v1, %v43_v18 }
  0x99   :  { %4447 = vrsqrt.f32 %v60_v20  ;;  %v57_v23 = vsub.f32 %v53_v22, %v55_v21 }
  0x9b   :  { %v61_v24 = vadd.f32 1e-12, %v57_v23 }
  0x9d   :  { %4449 = vrsqrt.f32 %v61_v24 }
  0xa3   :  { %v4448_v26 = vpop.eup %4447 }
  0xa4   :  { %v64_v27 = vmul.f32 %v4448_v26, %v58_v25 }
  0xa6   :  { %v70_v32 = vmul.f32 %v3909_v28, %v64_v27 }
  0xa7   :  { %v4450_v30 = vpop.eup %4449 }
  0xa8   :  { %v65_v31 = vmul.f32 %v4450_v30, %v59_v29  ;;  %v4628_v35 = vadd.f32 %v3910_v33, %v70_v32 }
  0xaa   :  { %v71_v34 = vmul.f32 %v3909_v28, %v65_v31 }
  0xac   :  { %v4630_v36 = vadd.f32 %v3910_v33, %v71_v34 }
  0xae   :  { %v120_v37 = vpack.c.bf16 %v4630_v36, %v4628_v35 }
  0xb0   :  { %4148 = vmatmul.mubr.msk.bf16.vlgmr.msra.gmra.mrb[0].mxu0 %vm34_vm0, %v120_v37 }
  0xb1   :  { %4168 = vmatprep.mubr.msk.f32.mxu0 %vm4540_vm1, %v4539_v8 }
 0x183   :  { %v178_v39 = vpop.f32.mrb[0].mxu0 }
 0x184   :  { %v4640_v40 = vadd.f32 %v3912_v38, %v178_v39  ;;  %v4149_v41 = vpop.f32.mrb[1].mxu0 }
 0x185   :  { %v181_v42 = vpop.f32.mrb[2].mxu0 }
 0x186   :  { %v4642_v43 = vadd.f32 %v3912_v38, %v181_v42  ;;  %186 = vrot.lane.b32.xlu0 %v4640_v40, %s4541_s18  ;;  %v4150_v44 = vpop.f32.mrb[3].mxu0 }
 0x188   :  { %264 = vrot.lane.b32.xlu1 %v4642_v43, %s4541_s18 }
 0x1f8   :  { %v187_v45 = vpop.permute.xlu0 %186 }
 0x1f9   :  { %4152 = vmatpush3.xpose.msk.msra.mxu1 %vm188_vm2, %v187_v45 }
 0x1fa   :  { %4156 = vmatprep.subr.mxu1 %v4539_v8  ;;  %v265_v46 = vpop.permute.xlu1 %264 }
 0x1fc   :  { %4154 = vmatmul.mubr.msk.f32.vlgmr.msra.gmra.mrb[0].mxu1 %vm188_vm2, %v4640_v40 }
 0x1fd   :  { %4157 = vmatpush3.xpose.msk.msra.mxu1 %vm188_vm2, %v265_v46  ;;  %4158 = vmatprep.mubr.msk.f32.mxu1 %vm4540_vm1, %v4539_v8 }
 0x1fe   :  { %4161 = vmatprep.subr.mxu1 %v4539_v8 }
 0x200   :  { %4159 = vmatmul.mubr.msk.f32.vlgmr.msra.gmra.mrb[2].mxu1 %vm188_vm2, %v4642_v43 }
 0x201   :  { %4163 = vmatprep.mubr.msk.f32.mxu1 %vm4540_vm1, %v4539_v8 }
 0x2cf   :  { %v259_v59 = vpop.f32.mrb[0].mxu1 }
 0x2d0   :  { %v260_v60 = vadd.f32 %v259_v59, %v4663_v57  ;;  %v4155_v61 = vpop.f32.mrb[1].mxu1  ;;  %v846_v59 = vld [vmem:[%s5183_s3 + $0x14] sm:$0xf] }
 0x2d2   :  { %v340_v63 = vsel %vm188_vm2, %v260_v60, -inf }
 0x2d3   :  { %341 = vmax.xlane.f32.xlu1 %v340_v63  ;;  %v336_v0 = vpop.f32.mrb[2].mxu1  ;;  %v853_v63 = vsel %vm851_vm3, %v846_v59, 0 }
 0x2d4   :  { %v337_v1 = vadd.f32 %v336_v0, %v4666_v62  ;;  %v4160_v2 = vpop.f32.mrb[3].mxu1  ;;  %v514_v0 = vld [vmem:[%s5183_s3 + $0x10] sm:$0xf] }
 0x2d6   :  { %v343_v3 = vsel %vm188_vm2, %v337_v1, -inf }
 0x2d7   :  { %344 = vmax.xlane.f32.xlu0 %v343_v3  ;;  %v900_v3 = vsel %vm851_vm3, %v514_v0, 0 }
 0x2e4   :  { %438 = vrot.lane.b32.xlu1 %v4642_v43, %s4543_s1 }
 0x2e8   :  { %518 = vrot.lane.b32.xlu1 %v4640_v40, %s4544_s21 }
 0x2ec   :  { %596 = vrot.lane.b32.xlu1 %v4642_v43, %s4544_s21 }
 0x2ed   :  { %362 = vrot.lane.b32.xlu0 %v4640_v40, %s4543_s1 }
 0x360   :  { %v342_v4 = vpop.xlane.xlu1 %341 }
 0x361   :  { %v346_v5 = vsub.f32 %v260_v60, %v342_v4 }
 0x363   :  { %v348_v6 = vmul.f32 1.442695, %v346_v5 }
 0x364   :  { %v345_v7 = vpop.xlane.xlu0 %344  ;;  %v439_v9 = vpop.permute.xlu1 %438 }
 0x365   :  { %4451 = vpow2.f32 %v348_v6  ;;  %v347_v10 = vsub.f32 %v337_v1, %v345_v7  ;;  %4167 = vmatpush3.msra.mxu0 %v439_v9 }
 0x366   :  { %4176 = vmatprep.subr.mxu0 %v4539_v8 }
 0x367   :  { %v350_v11 = vmul.f32 1.442695, %v347_v10 }
 0x368   :  { %v363_v12 = vpop.permute.xlu0 %362  ;;  %v519_v17 = vpop.permute.xlu1 %518 }
 0x369   :  { %4453 = vpow2.f32 %v350_v11  ;;  %4162 = vmatpush3.msra.mxu1 %v363_v12 }
 0x36a   :  { %4171 = vmatprep.subr.mxu1 %v4539_v8 }
 0x36c   :  { %v597_v18 = vpop.permute.xlu1 %596 }
 0x36f   :  { %v4452_v13 = vpop.eup %4451 }
 0x370   :  { %v352_v14 = vsel %vm188_vm2, %v4452_v13, 0.0 }
 0x371   :  { %353 = vadd.xlane.f32.xlu0 %v352_v14 }
 0x373   :  { %v4454_v15 = vpop.eup %4453 }
 0x374   :  { %v355_v16 = vsel %vm188_vm2, %v4454_v15, 0.0 }
 0x375   :  { %356 = vadd.xlane.f32.xlu1 %v355_v16 }
 0x386   :  { %594 = vrot.lane.b32.xlu1 %v4642_v43, %s4545_s22 }
 0x387   :  { %516 = vrot.lane.b32.xlu0 %v4640_v40, %s4545_s22 }
 0x3fe   :  { %v354_v19 = vpop.xlane.xlu0 %353 }
 0x3ff   :  { %4455 = vrcp.f32 %v354_v19 }
 0x402   :  { %v357_v20 = vpop.xlane.xlu1 %356  ;;  %v517_v25 = vpop.permute.xlu0 %516 }
 0x403   :  { %4457 = vrcp.f32 %v357_v20 }
 0x406   :  { %v595_v26 = vpop.permute.xlu1 %594 }
 0x409   :  { %v4456_v21 = vpop.eup %4455 }
 0x40a   :  { %v360_v22 = vmul.f32 %v4456_v21, %v4452_v13 }
 0x40c   :  { %4164 = vmatmul.mubr.msk.f32.vlgmr.msra.gmra.mrb[4].mxu1 %vm188_vm2, %v360_v22 }
 0x40d   :  { %v4458_v23 = vpop.eup %4457  ;;  %4172 = vmatpush3.xpose.msk.msra.mxu1 %vm188_vm2, %v519_v17  ;;  %4173 = vmatprep.mubr.msk.f32.mxu1 %vm4540_vm1, %v4539_v8 }
 0x40e   :  { %v361_v24 = vmul.f32 %v4458_v23, %v4454_v15  ;;  %4181 = vmatprep.subr.mxu1 %v4539_v8 }
 0x410   :  { %4169 = vmatmul.mubr.msk.f32.vlgmr.msra.gmra.mrb[4].mxu0 %vm188_vm2, %v361_v24  ;;  %4174 = vmatmul.mubr.msk.f32.vlgmr.msra.gmra.mrb[6].mxu1 %vm188_vm2, %v517_v25 }
 0x411   :  { %4177 = vmatpush3.xpose.msk.msra.mxu0 %vm188_vm2, %v597_v18  ;;  %4178 = vmatprep.mubr.msk.f32.mxu0 %vm4540_vm1, %v4539_v8 }
 0x412   :  { %4186 = vmatprep.subr.mxu0 %v4539_v8  ;;  %4183 = vmatprep.mubr.msk.f32.mxu1 %vm4540_vm1, %v4539_v8 }
 0x414   :  { %4179 = vmatmul.mubr.msk.f32.vlgmr.msra.gmra.mrb[6].mxu0 %vm188_vm2, %v595_v26 }
 0x415   :  { %4188 = vmatprep.mubr.msk.f32.mxu0 %vm4540_vm1, %v4539_v8 }
 0x4df   :  { %v4703_v27 = vpop.f32.mrb[4].mxu1 }
 0x4e0   :  { %v4165_v28 = vpop.f32.mrb[5].mxu1 }
 0x4e3   :  { %v4705_v29 = vpop.f32.mrb[4].mxu0  ;;  %v590_v30 = vpop.f32.mrb[6].mxu1 }
 0x4e4   :  { %v515_v31 = vpack.c.bf16 %v4705_v29, %v4703_v27  ;;  %v591_v32 = vadd.f32 %v590_v30, %v4663_v57  ;;  %v4170_v33 = vpop.f32.mrb[5].mxu0  ;;  %v4175_v34 = vpop.f32.mrb[7].mxu1 }
 0x4e6   :  { %v672_v37 = vsel %vm188_vm2, %v591_v32, -inf }
 0x4e7   :  { %673 = vmax.xlane.f32.xlu0 %v672_v37  ;;  %v668_v38 = vpop.f32.mrb[6].mxu0 }
 0x4e8   :  { %v669_v39 = vadd.f32 %v668_v38, %v4666_v62  ;;  %v4180_v41 = vpop.f32.mrb[7].mxu0 }
 0x4ea   :  { %v675_v42 = vsel %vm188_vm2, %v669_v39, -inf }
 0x4eb   :  { %676 = vmax.xlane.f32.xlu1 %v675_v42 }
 0x4fc   :  { %770 = vrot.lane.b32.xlu1 %v4642_v43, %s4546_s23 }
 0x500   :  { %1023 = vrot.lane.b32.xlu1 %v4642_v43, %s4547_s24 }
 0x504   :  { %1021 = vrot.lane.b32.xlu1 %v4642_v43, %s4548_s25 }
 0x508   :  { %943 = vrot.lane.b32.xlu1 %v4640_v40, %s4548_s25 }
 0x50c   :  { %1326 = vrot.lane.b32.xlu1 %v4640_v40, %s4549_s26 }
 0x574   :  { %v674_v44 = vpop.xlane.xlu0 %673 }
 0x575   :  { %v678_v45 = vsub.f32 %v591_v32, %v674_v44 }
 0x577   :  { %v680_v46 = vmul.f32 1.442695, %v678_v45 }
 0x578   :  { %v677_v47 = vpop.xlane.xlu1 %676 }
 0x579   :  { %4459 = vpow2.f32 %v680_v46  ;;  %v679_v48 = vsub.f32 %v669_v39, %v677_v47 }
 0x57b   :  { %v682_v49 = vmul.f32 1.442695, %v679_v48 }
 0x57c   :  { %v771_v50 = vpop.permute.xlu1 %770 }
 0x57d   :  { %4461 = vpow2.f32 %v682_v49  ;;  %4187 = vmatpush3.msra.mxu0 %v771_v50 }
 0x57e   :  { %4197 = vmatprep.subr.bf16.mxu0 %v4539_v8 }
 0x580   :  { %v1024_v4 = vpop.permute.xlu1 %1023 }
 0x583   :  { %v4460_v51 = vpop.eup %4459 }
 0x584   :  { %v684_v52 = vsel %vm188_vm2, %v4460_v51, 0.0  ;;  %v1022_v5 = vpop.permute.xlu1 %1021 }
 0x585   :  { %685 = vadd.xlane.f32.xlu0 %v684_v52 }
 0x587   :  { %v4462_v53 = vpop.eup %4461 }
 0x588   :  { %v687_v54 = vsel %vm188_vm2, %v4462_v53, 0.0  ;;  %v944_v17 = vpop.permute.xlu1 %943 }
 0x589   :  { %688 = vadd.xlane.f32.xlu0 %v687_v54 }
 0x58c   :  { %v1327_v41 = vpop.permute.xlu1 %1326 }
 0x59f   :  { %694 = vrot.lane.b32.xlu0 %v4640_v40, %s4546_s23 }
 0x5a3   :  { %945 = vrot.lane.b32.xlu0 %v4640_v40, %s4547_s24 }
 0x612   :  { %v686_v55 = vpop.xlane.xlu0 %685 }
 0x613   :  { %4463 = vrcp.f32 %v686_v55 }
 0x616   :  { %v689_v56 = vpop.xlane.xlu0 %688 }
 0x617   :  { %4465 = vrcp.f32 %v689_v56 }
 0x61a   :  { %v695_v58 = vpop.permute.xlu0 %694 }
 0x61b   :  { %4182 = vmatpush3.msra.mxu1 %v695_v58 }
 0x61c   :  { %4191 = vmatprep.subr.bf16.mxu1 %v4539_v8 }
 0x61d   :  { %v4464_v60 = vpop.eup %4463 }
 0x61e   :  { %v692_v61 = vmul.f32 %v4464_v60, %v4460_v51  ;;  %v946_v12 = vpop.permute.xlu0 %945 }
 0x620   :  { %4184 = vmatmul.mubr.msk.f32.vlgmr.msra.gmra.mrb[8].mxu1 %vm188_vm2, %v692_v61 }
 0x621   :  { %v4466_v1 = vpop.eup %4465  ;;  %4192 = vmatpush3.bf16.msra.mxu1 %v853_v63  ;;  %4193 = vmatprep.mubr.msk.bf16.mxu1 %vm4540_vm1, %v4539_v8 }
 0x622   :  { %v693_v2 = vmul.f32 %v4466_v1, %v4462_v53  ;;  %4203 = vmatprep.subr.mxu1 %v4539_v8 }
 0x624   :  { %4189 = vmatmul.mubr.msk.f32.vlgmr.msra.gmra.mrb[8].mxu0 %vm188_vm2, %v693_v2 }
 0x625   :  { %4198 = vmatpush3.bf16.msra.mxu0 %v900_v3  ;;  %4199 = vmatprep.mubr.msk.bf16.mxu0 %vm4540_vm1, %v4539_v8 }
 0x626   :  { %4208 = vmatprep.subr.mxu0 %v4539_v8 }
 0x628   :  { %4200 = vmatmul.mubr.msk.bf16.vlgmr.msra.gmra.mrb[12].mxu0 %vm188_vm2, %v515_v31 }
 0x629   :  { %4210 = vmatprep.mubr.msk.f32.mxu0 %vm4540_vm1, %v4539_v8 }
 0x62e   :  { %4209 = vmatpush3.xpose.msk.msra.mxu0 %vm188_vm2, %v1024_v4 }
 0x62f   :  { %4218 = vmatprep.subr.mxu0 %v4539_v8 }
 0x631   :  { %4211 = vmatmul.mubr.msk.f32.vlgmr.msra.gmra.mrb[10].mxu0 %vm188_vm2, %v1022_v5 }
 0x632   :  { %4220 = vmatprep.mubr.msk.f32.mxu0 %vm4540_vm1, %v4539_v8 }
 0x6f3   :  { %v766_v6 = vpop.f32.mrb[8].mxu1 }
 0x6f4   :  { %v4185_v7 = vpop.f32.mrb[9].mxu1 }
 0x6f7   :  { %v842_v9 = vpop.f32.mrb[8].mxu0 }
 0x6f8   :  { %v847_v10 = vpack.c.bf16 %v842_v9, %v766_v6  ;;  %v4190_v11 = vpop.f32.mrb[9].mxu0  ;;  %v1273_v6 = vld [vmem:[%s5183_s3 + $0x18] sm:$0xf] }
 0x6f9   :  { %v1279_v7 = vsel %vm851_vm3, %v1273_v6, 0 }
 0x6fa   :  { %4194 = vmatmul.mubr.msk.bf16.vlgmr.msra.gmra.mrb[12].mxu1 %vm188_vm2, %v847_v10 }
 0x6fb   :  { %4204 = vmatpush3.xpose.msk.msra.mxu1 %vm188_vm2, %v946_v12  ;;  %v936_v13 = vpop.f32.mrb[12].mxu0  ;;  %4205 = vmatprep.mubr.msk.f32.mxu1 %vm4540_vm1, %v4539_v8 }
 0x6fc   :  { %v4201_v14 = vpop.f32.mrb[13].mxu0  ;;  %4213 = vmatprep.subr.mxu1 %v4539_v8 }
 0x6fd   :  { %v939_v15 = vpop.f32.mrb[14].mxu0 }
 0x6fe   :  { %v4202_v16 = vpop.f32.mrb[15].mxu0 }
 0x702   :  { %4206 = vmatmul.mubr.msk.f32.vlgmr.msra.gmra.mrb[10].mxu1 %vm188_vm2, %v944_v17 }
 0x703   :  { %4215 = vmatprep.mubr.msk.f32.mxu1 %vm4540_vm1, %v4539_v8 }
 0x704   :  { %v1095_v18 = vpop.f32.mrb[10].mxu0 }
 0x705   :  { %v1096_v19 = vadd.f32 %v1095_v18, %v4666_v62  ;;  %v4212_v20 = vpop.f32.mrb[11].mxu0 }
 0x707   :  { %v1102_v21 = vsel %vm188_vm2, %v1096_v19, -inf }
 0x708   :  { %1103 = vmax.xlane.f32.xlu0 %v1102_v21 }
 0x71e   :  { %1197 = vrot.lane.b32.xlu0 %v4642_v43, %s4550_s9 }
 0x722   :  { %1324 = vrot.lane.b32.xlu0 %v4640_v40, %s4551_s10 }
 0x726   :  { %1402 = vrot.lane.b32.xlu0 %v4642_v43, %s4551_s10 }
 0x795   :  { %v1104_v22 = vpop.xlane.xlu0 %1103 }
 0x796   :  { %v1106_v23 = vsub.f32 %v1096_v19, %v1104_v22 }
 0x798   :  { %v1109_v24 = vmul.f32 1.442695, %v1106_v23 }
 0x799   :  { %v1198_v25 = vpop.permute.xlu0 %1197 }
 0x79a   :  { %4467 = vpow2.f32 %v1109_v24  ;;  %4219 = vmatpush3.msra.mxu0 %v1198_v25 }
 0x79b   :  { %4229 = vmatprep.subr.mxu0 %v4539_v8 }
 0x79d   :  { %v1325_v46 = vpop.permute.xlu0 %1324 }
 0x7a1   :  { %v1403_v48 = vpop.permute.xlu0 %1402 }
 0x7a4   :  { %v4468_v26 = vpop.eup %4467 }
 0x7a5   :  { %v1114_v27 = vsel %vm188_vm2, %v4468_v26, 0.0 }
 0x7a6   :  { %1115 = vadd.xlane.f32.xlu1 %v1114_v27 }
 0x7b7   :  { %1404 = vrot.lane.b32.xlu1 %v4642_v43, %s4549_s26 }
 0x7cd   :  { %v889_v28 = vpop.f32.mrb[12].mxu1 }
 0x7ce   :  { %v4778_v29 = vadd.f32 %v936_v13, %v889_v28  ;;  %v4195_v30 = vpop.f32.mrb[13].mxu1  ;;  %v1654_v28 = vld [vmem:[%s5183_s3 + $0x1c] sm:$0xf] }
 0x7cf   :  { %v892_v31 = vpop.f32.mrb[14].mxu1  ;;  %v1660_v30 = vsel %vm851_vm3, %v1654_v28, 0  ;;  %v4435_v28 = vld [vmem:[%s5188_s5 + $0x10] sm:$0xff]  }
 0x7d0   :  { %v4780_v32 = vadd.f32 %v939_v15, %v892_v31  ;;  %v4196_v33 = vpop.f32.mrb[15].mxu1 }
 0x7d5   :  { %v1017_v34 = vpop.f32.mrb[10].mxu1 }
 0x7d6   :  { %v1018_v37 = vadd.f32 %v1017_v34, %v4663_v57  ;;  %v4207_v38 = vpop.f32.mrb[11].mxu1 }
 0x7d8   :  { %v1099_v39 = vsel %vm188_vm2, %v1018_v37, -inf }
 0x7db   :  { %1100 = vmax.xlane.f32.xlu1 %v1099_v39 }
 0x833   :  { %v1116_v42 = vpop.xlane.xlu1 %1115 }
 0x834   :  { %4469 = vrcp.f32 %v1116_v42 }
 0x837   :  { %v1405_v47 = vpop.permute.xlu1 %1404 }
 0x83e   :  { %v4470_v44 = vpop.eup %4469 }
 0x83f   :  { %v1120_v45 = vmul.f32 %v4470_v44, %v4468_v26 }
 0x841   :  { %4221 = vmatmul.mubr.msk.f32.vlgmr.msra.gmra.mrb[16].mxu0 %vm188_vm2, %v1120_v45 }
 0x842   :  { %4230 = vmatpush3.xpose.msk.msra.mxu0 %vm188_vm2, %v1327_v41  ;;  %4231 = vmatprep.mubr.msk.f32.mxu0 %vm4540_vm1, %v4539_v8 }
 0x843   :  { %4234 = vmatprep.subr.mxu0 %v4539_v8 }
 0x845   :  { %4232 = vmatmul.mubr.msk.f32.vlgmr.msra.gmra.mrb[18].mxu0 %vm188_vm2, %v1325_v46 }
 0x846   :  { %4235 = vmatpush3.xpose.msk.msra.mxu0 %vm188_vm2, %v1405_v47  ;;  %4236 = vmatprep.mubr.msk.f32.mxu0 %vm4540_vm1, %v4539_v8 }
 0x847   :  { %4244 = vmatprep.subr.mxu0 %v4539_v8 }
 0x849   :  { %4237 = vmatmul.mubr.msk.f32.vlgmr.msra.gmra.mrb[20].mxu0 %vm188_vm2, %v1403_v48 }
 0x84a   :  { %4246 = vmatprep.mubr.msk.f32.mxu0 %vm4540_vm1, %v4539_v8 }
 0x868   :  { %v1101_v49 = vpop.xlane.xlu1 %1100 }
 0x869   :  { %v1105_v50 = vsub.f32 %v1018_v37, %v1101_v49 }
 0x86b   :  { %v1107_v51 = vmul.f32 1.442695, %v1105_v50 }
 0x86d   :  { %4471 = vpow2.f32 %v1107_v51 }
 0x877   :  { %v4472_v52 = vpop.eup %4471 }
 0x878   :  { %v1111_v53 = vsel %vm188_vm2, %v4472_v52, 0.0 }
 0x879   :  { %1112 = vadd.xlane.f32.xlu0 %v1111_v53 }
 0x88f   :  { %1121 = vrot.lane.b32.xlu0 %v4640_v40, %s4550_s9 }
 0x893   :  { %1578 = vrot.lane.b32.xlu0 %v4642_v43, %s4552_s0 }
 0x906   :  { %v1113_v54 = vpop.xlane.xlu0 %1112 }
 0x907   :  { %4473 = vrcp.f32 %v1113_v54 }
 0x90a   :  { %v1122_v55 = vpop.permute.xlu0 %1121 }
 0x90b   :  { %4214 = vmatpush3.msra.mxu1 %v1122_v55 }
 0x90c   :  { %4223 = vmatprep.subr.bf16.mxu1 %v4539_v8 }
 0x90e   :  { %v1579_v56 = vpop.permute.xlu0 %1578 }
 0x90f   :  { %4245 = vmatpush3.msra.mxu0 %v1579_v56 }
 0x910   :  { %4255 = vmatprep.subr.bf16.mxu0 %v4539_v8 }
 0x911   :  { %v4474_v58 = vpop.eup %4473 }
 0x912   :  { %v1119_v59 = vmul.f32 %v4474_v58, %v4472_v52 }
 0x914   :  { %4216 = vmatmul.mubr.msk.f32.vlgmr.msra.gmra.mrb[16].mxu1 %vm188_vm2, %v1119_v59  ;;  %v1269_v60 = vpop.f32.mrb[16].mxu0 }
 0x915   :  { %v4222_v61 = vpop.f32.mrb[17].mxu0  ;;  %4225 = vmatprep.mubr.msk.bf16.mxu1 %vm4540_vm1, %v4539_v8  ;;  %4224 = vmatpush3.bf16.msra.mxu1 %v1279_v7 }
 0x916   :  { %4239 = vmatprep.subr.mxu1 %v4539_v8 }
 0x918   :  { %v1398_v43 = vpop.f32.mrb[18].mxu0 }
 0x919   :  { %v1399_v63 = vadd.f32 %v1398_v43, %v4663_v57  ;;  %v4233_v0 = vpop.f32.mrb[19].mxu0 }
 0x91b   :  { %v1480_v1 = vsel %vm188_vm2, %v1399_v63, -inf }
 0x91c   :  { %1481 = vmax.xlane.f32.xlu1 %v1480_v1  ;;  %v1476_v2 = vpop.f32.mrb[20].mxu0 }
 0x91d   :  { %v1477_v3 = vadd.f32 %v1476_v2, %v4666_v62  ;;  %v4238_v4 = vpop.f32.mrb[21].mxu0 }
 0x91f   :  { %v1483_v5 = vsel %vm188_vm2, %v1477_v3, -inf }
 0x920   :  { %1484 = vmax.xlane.f32.xlu1 %v1483_v5 }
 0x9a9   :  { %v1482_v9 = vpop.xlane.xlu1 %1481 }
 0x9aa   :  { %v1486_v10 = vsub.f32 %v1399_v63, %v1482_v9 }
 0x9ac   :  { %v1488_v11 = vmul.f32 1.442695, %v1486_v10 }
 0x9ad   :  { %v1485_v12 = vpop.xlane.xlu1 %1484 }
 0x9ae   :  { %4475 = vpow2.f32 %v1488_v11  ;;  %v1487_v13 = vsub.f32 %v1477_v3, %v1485_v12 }
 0x9b0   :  { %v1490_v14 = vmul.f32 1.442695, %v1487_v13 }
 0x9b2   :  { %4477 = vpow2.f32 %v1490_v14 }
 0x9b8   :  { %v4476_v15 = vpop.eup %4475 }
 0x9b9   :  { %v1492_v16 = vsel %vm188_vm2, %v4476_v15, 0.0 }
 0x9ba   :  { %1493 = vadd.xlane.f32.xlu1 %v1492_v16 }
 0x9bc   :  { %v4478_v17 = vpop.eup %4477 }
 0x9bd   :  { %v1495_v18 = vsel %vm188_vm2, %v4478_v17, 0.0 }
 0x9be   :  { %1496 = vadd.xlane.f32.xlu1 %v1495_v18 }
 0x9cf   :  { %1502 = vrot.lane.b32.xlu1 %v4640_v40, %s4552_s0 }
 0x9e7   :  { %v1193_v19 = vpop.f32.mrb[16].mxu1 }
 0x9e8   :  { %v1274_v20 = vpack.c.bf16 %v1269_v60, %v1193_v19  ;;  %v4217_v21 = vpop.f32.mrb[17].mxu1 }
 0x9ea   :  { %4226 = vmatmul.mubr.msk.bf16.vlgmr.msra.gmra.mrb[20].mxu1 %vm188_vm2, %v1274_v20 }
 0x9eb   :  { %4241 = vmatprep.mubr.msk.f32.mxu1 %vm4540_vm1, %v4539_v8 }
 0xa47   :  { %v1494_v22 = vpop.xlane.xlu1 %1493 }
 0xa48   :  { %4479 = vrcp.f32 %v1494_v22  ;;  %v3946_v22 = vld [vmem:[%s5185_s6 + $0x3] ss:$0 sm:$0xff] }
 0xa4b   :  { %v1497_v23 = vpop.xlane.xlu1 %1496 }
 0xa4c   :  { %4481 = vrcp.f32 %v1497_v23 }
 0xa4f   :  { %v1503_v24 = vpop.permute.xlu1 %1502 }
 0xa50   :  { %4240 = vmatpush3.msra.mxu1 %v1503_v24 }
 0xa51   :  { %4249 = vmatprep.subr.bf16.mxu1 %v4539_v8 }
 0xa52   :  { %v4480_v25 = vpop.eup %4479 }
 0xa53   :  { %v1500_v26 = vmul.f32 %v4480_v25, %v4476_v15 }
 0xa55   :  { %4242 = vmatmul.mubr.msk.f32.vlgmr.msra.gmra.mrb[18].mxu1 %vm188_vm2, %v1500_v26 }
 0xa56   :  { %v4482_v40 = vpop.eup %4481  ;;  %4251 = vmatprep.mubr.msk.bf16.mxu1 %vm4540_vm1, %v4539_v8  ;;  %4250 = vmatpush3.bf16.msra.mxu1 %v1660_v30  ;;  %v4436_v30 = vld [vmem:[%s5188_s5 + $0x18] sm:$0xff]  }
 0xa57   :  { %v1501_v27 = vmul.f32 %v4482_v40, %v4478_v17  ;;  %4263 = vmatprep.subr.bf16.mxu1 %v4539_v8  ;;  %v3945_v17 = vld [vmem:[%s5185_s6 + $0x2] ss:$0 sm:$0xff] }
 0xa58   :  { %v4433_v40 = vld [vmem:[%s5188_s5] sm:$0xff]  }
 0xa59   :  { %4247 = vmatmul.mubr.msk.f32.vlgmr.msra.gmra.mrb[22].mxu0 %vm188_vm2, %v1501_v27  ;;  %v4434_v27 = vld [vmem:[%s5188_s5 + $0x8] sm:$0xff]  }
 0xa5a   :  { %4259 = vmatprep.mubr.msk.bf16.mxu0 %vm4540_vm1, %v4539_v8 }
 0xabd   :  { %v1315_v31 = vpop.f32.mrb[20].mxu1 }
 0xabe   :  { %v1322_v33 = vadd.f32 %v1315_v31, %v4778_v29  ;;  %v4227_v34 = vpop.f32.mrb[21].mxu1  ;;  %v3944_v29 = vld [vmem:[%s5185_s6 + $0x1] ss:$0 sm:$0xff]  ;;  %v3947_v31 = vld [vmem:[%s5185_s6 + $0x4] ss:$0 sm:$0xff] }
 0xabf   :  { %v1318_v37 = vpop.f32.mrb[22].mxu1 }
 0xac0   :  { %v1323_v38 = vadd.f32 %v1318_v37, %v4780_v32  ;;  %v4228_v39 = vpop.f32.mrb[23].mxu1 }
 0xb28   :  { %v1574_v41 = vpop.f32.mrb[18].mxu1 }
 0xb29   :  { %v4243_v42 = vpop.f32.mrb[19].mxu1 }
 0xb2c   :  { %v1650_v44 = vpop.f32.mrb[22].mxu0 }
 0xb2d   :  { %v1655_v45 = vpack.c.bf16 %v1650_v44, %v1574_v41  ;;  %v4248_v46 = vpop.f32.mrb[23].mxu0 }
 0xb2f   :  { %4252 = vmatmul.mubr.msk.bf16.vlgmr.msra.gmra.mrb[24].mxu1 %vm188_vm2, %v1655_v45 }
 0xb30   :  { %4271 = vmatprep.mubr.msk.bf16.mxu1 %vm4540_vm1, %v4539_v8  ;;  %4264 = vmatpush3.bf16.msra.mxu1 %v4433_v40 }
 0xb31   :  { %4265 = vmatprep.subr.bf16.mxu1 %v4539_v8 }
 0xb34   :  { %4266 = vmatpush3.bf16.msra.mxu1 %v4434_v27 }
 0xb35   :  { %4267 = vmatprep.subr.bf16.mxu1 %v4539_v8 }
 0xb38   :  { %4268 = vmatpush3.bf16.msra.mxu1 %v4435_v28  ;;  %v3957_v28 = vld [vmem:[%s5185_s6 + $0x6] ss:$0 sm:$0xff] }
 0xb39   :  { %4269 = vmatprep.subr.bf16.mxu1 %v4539_v8 }
 0xb3c   :  { %4270 = vmatpush3.bf16.msra.mxu1 %v4436_v30 }
 0xb3d   :  { %4288 = vmatprep.subr.mxu1 %v4539_v8 }
 0xc02   :  { %v1696_v47 = vpop.f32.mrb[24].mxu1 }
 0xc03   :  { %v1703_v48 = vadd.f32 %v1696_v47, %v1322_v33  ;;  %v4253_v49 = vpop.f32.mrb[25].mxu1 }
 0xc04   :  { %v1699_v50 = vpop.f32.mrb[26].mxu1 }
 0xc05   :  { %v1705_v32 = vadd.f32 %v1703_v48, %v4628_v35  ;;  %v1704_v51 = vadd.f32 %v1699_v50, %v1323_v38  ;;  %v4254_v52 = vpop.f32.mrb[27].mxu1  ;;  %v4431_v35 = vld [vmem:[%s5187_s4] sm:$0xff]  }
 0xc06   :  { %4256 = vmatpush3.bf16.msra.mxu0 %v4431_v35 }
 0xc07   :  { %v1711_v53 = vadd.f32 %v3944_v29, %v1705_v32  ;;  %v1706_v54 = vadd.f32 %v1704_v51, %v4630_v36  ;;  %v4432_v36 = vld [vmem:[%s5187_s4 + $0x8] sm:$0xff]   ;;  %4257 = vmatprep.subr.bf16.mxu0 %v4539_v8 }
 0xc09   :  { %v1712_v55 = vadd.f32 %v3944_v29, %v1706_v54  ;;  %v1713_v56 = vsel %vm34_vm0, %v1711_v53, 0.0  ;;  %v1721_v58 = vmul.f32 %v1711_v53, %v1711_v53 }
 0xc0a   :  { %1714 = vadd.xlane.f32.xlu0 %v1713_v56  ;;  %4258 = vmatpush3.bf16.msra.mxu0 %v4432_v36 }
 0xc0b   :  { %v1716_v59 = vsel %vm34_vm0, %v1712_v55, 0.0  ;;  %v1723_v60 = vsel %vm34_vm0, %v1721_v58, 0.0  ;;  %v1722_v61 = vmul.f32 %v1712_v55, %v1712_v55  ;;  %4275 = vmatprep.subr.bf16.mxu0 %v4539_v8 }
 0xc0c   :  { %1717 = vadd.xlane.f32.xlu1 %v1716_v59 }
 0xc0d   :  { %v1726_v43 = vsel %vm34_vm0, %v1722_v61, 0.0  ;;  %v3951_v61 = vld [vmem:[%s5185_s6 + $0x5] ss:$0 sm:$0xff] }
 0xc0e   :  { %1724 = vadd.xlane.f32.xlu0 %v1723_v60 }
 0xc12   :  { %1727 = vadd.xlane.f32.xlu0 %v1726_v43 }
 0xc97   :  { %v1715_v63 = vpop.xlane.xlu0 %1714 }
 0xc98   :  { %v1719_v0 = vmul.f32 0.03125, %v1715_v63 }
 0xc99   :  { %v1718_v1 = vpop.xlane.xlu1 %1717 }
 0xc9a   :  { %v1731_v3 = vmul.f32 %v1719_v0, %v1719_v0  ;;  %v1720_v4 = vmul.f32 0.03125, %v1718_v1  ;;  %v1735_v14 = vsub.f32 %v1711_v53, %v1719_v0 }
 0xc9b   :  { %v1725_v2 = vpop.xlane.xlu0 %1724 }
 0xc9c   :  { %v1729_v5 = vmul.f32 0.03125, %v1725_v2  ;;  %v1732_v9 = vmul.f32 %v1720_v4, %v1720_v4  ;;  %v1736_v18 = vsub.f32 %v1712_v55, %v1720_v4 }
 0xc9e   :  { %v1733_v6 = vsub.f32 %v1729_v5, %v1731_v3 }
 0xc9f   :  { %v1728_v7 = vpop.xlane.xlu0 %1727 }
 0xca0   :  { %v1737_v10 = vadd.f32 1e-12, %v1733_v6  ;;  %v1730_v11 = vmul.f32 0.03125, %v1728_v7 }
 0xca2   :  { %4483 = vrsqrt.f32 %v1737_v10  ;;  %v1734_v12 = vsub.f32 %v1730_v11, %v1732_v9  ;;  %v4437_v11 = vld [vmem:[%s5183_s3 + $0x20] sm:$0xff]  }
 0xca4   :  { %v1738_v13 = vadd.f32 1e-12, %v1734_v12  ;;  %v4438_v12 = vld [vmem:[%s5183_s3 + $0x28] sm:$0xff]  }
 0xca6   :  { %4485 = vrsqrt.f32 %v1738_v13 }
 0xcac   :  { %v4484_v15 = vpop.eup %4483 }
 0xcad   :  { %v1741_v16 = vmul.f32 %v4484_v15, %v1735_v14 }
 0xcaf   :  { %v1747_v21 = vmul.f32 %v3945_v17, %v1741_v16 }
 0xcb0   :  { %v4486_v19 = vpop.eup %4485 }
 0xcb1   :  { %v1742_v20 = vmul.f32 %v4486_v19, %v1736_v18  ;;  %v1753_v24 = vadd.f32 %v3946_v22, %v1747_v21 }
 0xcb3   :  { %v1748_v23 = vmul.f32 %v3945_v17, %v1742_v20 }
 0xcb5   :  { %v1754_v25 = vadd.f32 %v3946_v22, %v1748_v23 }
 0xcb7   :  { %v1755_v26 = vpack.c.bf16 %v1754_v25, %v1753_v24 }
 0xcb9   :  { %4260 = vmatmul.mubr.msk.bf16.vlgmr.msra.gmra.mrb[24].mxu0 %vm34_vm0, %v1755_v26 }
 0xcba   :  { %4279 = vmatprep.mubr.msk.bf16.mxu0 %vm4540_vm1, %v4539_v8  ;;  %4276 = vmatpush3.bf16.msra.mxu0 %v4437_v11 }
 0xcbb   :  { %4277 = vmatprep.subr.bf16.mxu0 %v4539_v8 }
 0xcbe   :  { %4278 = vmatpush3.bf16.msra.mxu0 %v4438_v12 }
 0xcbf   :  { %4283 = vmatprep.subr.mxu0 %v4539_v8 }
 0xd8c   :  { %v1813_v33 = vpop.f32.mrb[24].mxu0 }
 0xd8d   :  { %v1814_v34 = vadd.f32 %v3947_v31, %v1813_v33  ;;  %v4261_v37 = vpop.f32.mrb[25].mxu0 }
 0xd8e   :  { %v1816_v38 = vpop.f32.mrb[26].mxu0 }
 0xd8f   :  { %v1820_v39 = vmul.f32 %v1814_v34, %v1814_v34  ;;  %v1817_v41 = vadd.f32 %v3947_v31, %v1816_v38  ;;  %v4262_v42 = vpop.f32.mrb[27].mxu0  ;;  %v3958_v38 = vld [vmem:[%s5185_s6 + $0x7] ss:$0 sm:$0xff] }
 0xd91   :  { %v1822_v44 = vmul.f32 %v1820_v39, %v1814_v34  ;;  %v1821_v45 = vmul.f32 %v1817_v41, %v1817_v41 }
 0xd93   :  { %v1824_v46 = vmul.f32 0.044715, %v1822_v44  ;;  %v1823_v47 = vmul.f32 %v1821_v45, %v1817_v41  ;;  %v3971_v45 = vld [vmem:[%s5185_s6 + $0x8] ss:$0 sm:$0xff] }
 0xd95   :  { %v1826_v48 = vadd.f32 %v1824_v46, %v1814_v34  ;;  %v1825_v49 = vmul.f32 0.044715, %v1823_v47 }
 0xd97   :  { %v1828_v29 = vmul.f32 0.7978846, %v1826_v48  ;;  %v1827_v50 = vadd.f32 %v1825_v49, %v1817_v41 }
 0xd99   :  { %4487 = vtanh.f32 %v1828_v29  ;;  %v1829_v32 = vmul.f32 0.7978846, %v1827_v50 }
 0xd9b   :  { %4489 = vtanh.f32 %v1829_v32 }
 0xda3   :  { %v4488_v51 = vpop.eup %4487 }
 0xda4   :  { %v1832_v52 = vadd.f32 1.0, %v4488_v51 }
 0xda5   :  { %v4490_v53 = vpop.eup %4489 }
 0xda6   :  { %v1834_v54 = vmul.f32 0.5, %v1832_v52  ;;  %v1833_v55 = vadd.f32 1.0, %v4490_v53 }
 0xda8   :  { %v1835_v56 = vmul.f32 0.5, %v1833_v55  ;;  %v1836_v58 = vmul.f32 %v1834_v54, %v1814_v34 }
 0xdaa   :  { %v1837_v59 = vmul.f32 %v1835_v56, %v1817_v41 }
 0xdac   :  { %v1838_v60 = vpack.c.bf16 %v1837_v59, %v1836_v58 }
 0xdae   :  { %4272 = vmatmul.mubr.msk.bf16.vlgmr.msra.gmra.mrb[28].mxu1 %vm1875_vm4, %v1838_v60 }
 0xdaf   :  { %4290 = vmatprep.mubr.msk.f32.mxu1 %vm4540_vm1, %v4539_v8 }
 0xe81   :  { %v1913_v43 = vpop.f32.mrb[28].mxu1 }
 0xe82   :  { %v1914_v35 = vadd.f32 %v3951_v61, %v1913_v43  ;;  %v4273_v36 = vpop.f32.mrb[29].mxu1 }
 0xe83   :  { %v1916_v63 = vpop.f32.mrb[30].mxu1 }
 0xe84   :  { %v1920_v0 = vadd.f32 %v1914_v35, %v1753_v24  ;;  %v1917_v1 = vadd.f32 %v3951_v61, %v1916_v63  ;;  %v4274_v2 = vpop.f32.mrb[31].mxu1 }
 0xe86   :  { %v1921_v3 = vadd.f32 %v1917_v1, %v1754_v25  ;;  %v1922_v4 = vsel %vm34_vm0, %v1920_v0, 0.0  ;;  %v1930_v9 = vmul.f32 %v1920_v0, %v1920_v0 }
 0xe87   :  { %1923 = vadd.xlane.f32.xlu0 %v1922_v4 }
 0xe88   :  { %v1931_v5 = vmul.f32 %v1921_v3, %v1921_v3  ;;  %v1925_v7 = vsel %vm34_vm0, %v1921_v3, 0.0  ;;  %v1932_v10 = vsel %vm34_vm0, %v1930_v9, 0.0 }
 0xe8a   :  { %v1935_v6 = vsel %vm34_vm0, %v1931_v5, 0.0 }
 0xe8b   :  { %1936 = vadd.xlane.f32.xlu1 %v1935_v6  ;;  %1926 = vadd.xlane.f32.xlu0 %v1925_v7 }
 0xe8f   :  { %1933 = vadd.xlane.f32.xlu0 %v1932_v10 }
 0xf14   :  { %v1924_v13 = vpop.xlane.xlu0 %1923 }
 0xf15   :  { %v1928_v16 = vmul.f32 0.03125, %v1924_v13 }
 0xf17   :  { %v1940_v21 = vmul.f32 %v1928_v16, %v1928_v16  ;;  %v1944_v30 = vsub.f32 %v1920_v0, %v1928_v16 }
 0xf18   :  { %v1937_v14 = vpop.xlane.xlu1 %1936  ;;  %v1927_v15 = vpop.xlane.xlu0 %1926 }
 0xf19   :  { %v1929_v17 = vmul.f32 0.03125, %v1927_v15  ;;  %v1939_v18 = vmul.f32 0.03125, %v1937_v14 }
 0xf1b   :  { %v1941_v19 = vmul.f32 %v1929_v17, %v1929_v17  ;;  %v1945_v40 = vsub.f32 %v1921_v3, %v1929_v17 }
 0xf1c   :  { %v1934_v20 = vpop.xlane.xlu0 %1933 }
 0xf1d   :  { %v1943_v22 = vsub.f32 %v1939_v18, %v1941_v19  ;;  %v1938_v23 = vmul.f32 0.03125, %v1934_v20 }
 0xf1f   :  { %v1947_v24 = vadd.f32 1e-12, %v1943_v22  ;;  %v1942_v25 = vsub.f32 %v1938_v23, %v1940_v21 }
 0xf21   :  { %4491 = vrsqrt.f32 %v1947_v24  ;;  %v1946_v26 = vadd.f32 1e-12, %v1942_v25 }
 0xf23   :  { %4493 = vrsqrt.f32 %v1946_v26 }
 0xf2b   :  { %v4492_v27 = vpop.eup %4491 }
 0xf2c   :  { %v1951_v31 = vmul.f32 %v4492_v27, %v1945_v40 }
 0xf2d   :  { %v4494_v33 = vpop.eup %4493 }
 0xf2e   :  { %v1957_v34 = vmul.f32 %v3957_v28, %v1951_v31  ;;  %v1950_v37 = vmul.f32 %v4494_v33, %v1944_v30 }
 0xf30   :  { %v1956_v39 = vmul.f32 %v3957_v28, %v1950_v37  ;;  %v4909_v41 = vadd.f32 %v3958_v38, %v1957_v34 }
 0xf32   :  { %v4911_v42 = vadd.f32 %v3958_v38, %v1956_v39 }
 0xf34   :  { %v1973_v44 = vpack.c.bf16 %v4909_v41, %v4911_v42 }
 0xf36   :  { %4280 = vmatmul.mubr.msk.bf16.vlgmr.msra.gmra.mrb[28].mxu0 %vm34_vm0, %v1973_v44 }
 0xf37   :  { %4285 = vmatprep.mubr.msk.f32.mxu0 %vm4540_vm1, %v4539_v8 }
0x1009   :  { %v2032_v46 = vpop.f32.mrb[28].mxu0 }
0x100a   :  { %v4921_v47 = vadd.f32 %v3971_v45, %v2032_v46  ;;  %v4281_v48 = vpop.f32.mrb[29].mxu0 }
0x100b   :  { %v2035_v49 = vpop.f32.mrb[30].mxu0 }
0x100c   :  { %v4923_v29 = vadd.f32 %v3971_v45, %v2035_v49  ;;  %2040 = vrot.lane.b32.xlu0 %v4921_v47, %s4541_s18  ;;  %v4282_v50 = vpop.f32.mrb[31].mxu0 }
0x100e   :  { %2117 = vrot.lane.b32.xlu1 %v4923_v29, %s4541_s18 }
0x107e   :  { %v2041_v32 = vpop.permute.xlu0 %2040 }
0x107f   :  { %4284 = vmatpush3.xpose.msk.msra.mxu0 %vm188_vm2, %v2041_v32 }
0x1080   :  { %v2118_v51 = vpop.permute.xlu1 %2117  ;;  %4293 = vmatprep.subr.mxu0 %v4539_v8 }
0x1081   :  { %4289 = vmatpush3.xpose.msk.msra.mxu1 %vm188_vm2, %v2118_v51 }
0x1082   :  { %4286 = vmatmul.mubr.msk.f32.vlgmr.msra.gmra.mrb[32].mxu0 %vm188_vm2, %v4921_v47  ;;  %4298 = vmatprep.subr.mxu1 %v4539_v8 }
0x1083   :  { %4295 = vmatprep.mubr.msk.f32.mxu0 %vm4540_vm1, %v4539_v8 }
0x1084   :  { %4291 = vmatmul.mubr.msk.f32.vlgmr.msra.gmra.mrb[32].mxu1 %vm188_vm2, %v4923_v29 }
0x1085   :  { %4300 = vmatprep.mubr.msk.f32.mxu1 %vm4540_vm1, %v4539_v8 }
0x1155   :  { %v2112_v52 = vpop.f32.mrb[32].mxu0 }
0x1156   :  { %v2113_v53 = vadd.f32 %v2112_v52, %v4663_v57  ;;  %v4287_v54 = vpop.f32.mrb[33].mxu0  ;;  %v3988_v52 = vld [vmem:[%s5183_s3 + $0x34] sm:$0xf] }
0x1157   :  { %v2189_v55 = vpop.f32.mrb[32].mxu1 }
0x1158   :  { %v2190_v56 = vadd.f32 %v2189_v55, %v4666_v62  ;;  %v4292_v58 = vpop.f32.mrb[33].mxu1  ;;  %v2193_v59 = vsel %vm188_vm2, %v2113_v53, -inf  ;;  %v2705_v55 = vsel %vm851_vm3, %v3988_v52, 0 }
0x1159   :  { %2194 = vmax.xlane.f32.xlu1 %v2193_v59 }
0x115a   :  { %v2196_v60 = vsel %vm188_vm2, %v2190_v56, -inf }
0x115b   :  { %2197 = vmax.xlane.f32.xlu0 %v2196_v60 }
0x116a   :  { %2291 = vrot.lane.b32.xlu1 %v4923_v29, %s4543_s1 }
0x116e   :  { %2371 = vrot.lane.b32.xlu1 %v4921_v47, %s4544_s21 }
0x1171   :  { %2215 = vrot.lane.b32.xlu0 %v4921_v47, %s4543_s1 }
0x1172   :  { %2449 = vrot.lane.b32.xlu1 %v4923_v29, %s4544_s21 }
0x11e6   :  { %v2195_v61 = vpop.xlane.xlu1 %2194 }
0x11e7   :  { %v2199_v43 = vsub.f32 %v2113_v53, %v2195_v61 }
0x11e8   :  { %v2198_v35 = vpop.xlane.xlu0 %2197 }
0x11e9   :  { %v2201_v36 = vmul.f32 1.442695, %v2199_v43  ;;  %v2200_v63 = vsub.f32 %v2190_v56, %v2198_v35  ;;  %v3981_v56 = vld [vmem:[%s5183_s3 + $0x30] sm:$0xf] }
0x11ea   :  { %v2292_v0 = vpop.permute.xlu1 %2291  ;;  %v2752_v60 = vsel %vm851_vm3, %v3981_v56, 0 }
0x11eb   :  { %4495 = vpow2.f32 %v2201_v36  ;;  %v2203_v1 = vmul.f32 1.442695, %v2200_v63  ;;  %4299 = vmatpush3.msra.mxu1 %v2292_v0 }
0x11ec   :  { %v2216_v2 = vpop.permute.xlu0 %2215  ;;  %4308 = vmatprep.subr.mxu1 %v4539_v8 }
0x11ed   :  { %4497 = vpow2.f32 %v2203_v1  ;;  %4294 = vmatpush3.msra.mxu0 %v2216_v2 }
0x11ee   :  { %4303 = vmatprep.subr.mxu0 %v4539_v8  ;;  %v2372_v7 = vpop.permute.xlu1 %2371 }
0x11f2   :  { %v2450_v9 = vpop.permute.xlu1 %2449 }
0x11f5   :  { %v4496_v3 = vpop.eup %4495 }
0x11f6   :  { %v2205_v4 = vsel %vm188_vm2, %v4496_v3, 0.0 }
0x11f7   :  { %v4498_v5 = vpop.eup %4497  ;;  %2206 = vadd.xlane.f32.xlu0 %v2205_v4 }
0x11f8   :  { %v2208_v6 = vsel %vm188_vm2, %v4498_v5, 0.0 }
0x11f9   :  { %2209 = vadd.xlane.f32.xlu1 %v2208_v6 }
0x120a   :  { %2447 = vrot.lane.b32.xlu1 %v4923_v29, %s4545_s22 }
0x120d   :  { %2369 = vrot.lane.b32.xlu0 %v4921_v47, %s4545_s22 }
0x1284   :  { %v2207_v10 = vpop.xlane.xlu0 %2206 }
0x1285   :  { %4499 = vrcp.f32 %v2207_v10 }
0x1286   :  { %v2210_v11 = vpop.xlane.xlu1 %2209 }
0x1287   :  { %4501 = vrcp.f32 %v2210_v11 }
0x1288   :  { %v2370_v16 = vpop.permute.xlu0 %2369 }
0x128a   :  { %v2448_v17 = vpop.permute.xlu1 %2447 }
0x128f   :  { %v4500_v12 = vpop.eup %4499 }
0x1290   :  { %v2213_v13 = vmul.f32 %v4500_v12, %v4496_v3 }
0x1291   :  { %v4502_v14 = vpop.eup %4501 }
0x1292   :  { %v2214_v15 = vmul.f32 %v4502_v14, %v4498_v5  ;;  %4296 = vmatmul.mubr.msk.f32.vlgmr.msra.gmra.mrb[34].mxu0 %vm188_vm2, %v2213_v13 }
0x1293   :  { %4304 = vmatpush3.xpose.msk.msra.mxu0 %vm188_vm2, %v2372_v7  ;;  %4305 = vmatprep.mubr.msk.f32.mxu0 %vm4540_vm1, %v4539_v8 }
0x1294   :  { %4301 = vmatmul.mubr.msk.f32.vlgmr.msra.gmra.mrb[34].mxu1 %vm188_vm2, %v2214_v15  ;;  %4313 = vmatprep.subr.mxu0 %v4539_v8 }
0x1295   :  { %4309 = vmatpush3.xpose.msk.msra.mxu1 %vm188_vm2, %v2450_v9  ;;  %4310 = vmatprep.mubr.msk.f32.mxu1 %vm4540_vm1, %v4539_v8 }
0x1296   :  { %4306 = vmatmul.mubr.msk.f32.vlgmr.msra.gmra.mrb[36].mxu0 %vm188_vm2, %v2370_v16  ;;  %4318 = vmatprep.subr.mxu1 %v4539_v8 }
0x1297   :  { %4315 = vmatprep.mubr.msk.f32.mxu0 %vm4540_vm1, %v4539_v8 }
0x1298   :  { %4311 = vmatmul.mubr.msk.f32.vlgmr.msra.gmra.mrb[36].mxu1 %vm188_vm2, %v2448_v17 }
0x1299   :  { %4320 = vmatprep.mubr.msk.f32.mxu1 %vm4540_vm1, %v4539_v8 }
0x1365   :  { %v4977_v18 = vpop.f32.mrb[34].mxu0 }
0x1366   :  { %v4297_v19 = vpop.f32.mrb[35].mxu0 }
0x1367   :  { %v2363_v20 = vpop.f32.mrb[34].mxu1 }
0x1368   :  { %v2368_v21 = vpack.c.bf16 %v2363_v20, %v4977_v18  ;;  %v4302_v22 = vpop.f32.mrb[35].mxu1 }
0x1369   :  { %v2443_v23 = vpop.f32.mrb[36].mxu0 }
0x136a   :  { %v2444_v24 = vadd.f32 %v2443_v23, %v4663_v57  ;;  %v4307_v25 = vpop.f32.mrb[37].mxu0 }
0x136b   :  { %v2521_v26 = vpop.f32.mrb[36].mxu1 }
0x136c   :  { %v2522_v40 = vadd.f32 %v2521_v26, %v4666_v62  ;;  %v4312_v27 = vpop.f32.mrb[37].mxu1  ;;  %v2525_v28 = vsel %vm188_vm2, %v2444_v24, -inf }
0x136d   :  { %2526 = vmax.xlane.f32.xlu0 %v2525_v28 }
0x136e   :  { %v2528_v30 = vsel %vm188_vm2, %v2522_v40, -inf }
0x136f   :  { %2529 = vmax.xlane.f32.xlu1 %v2528_v30 }
0x1380   :  { %2623 = vrot.lane.b32.xlu1 %v4923_v29, %s4546_s23 }
0x1384   :  { %2875 = vrot.lane.b32.xlu1 %v4923_v29, %s4547_s24 }
0x1388   :  { %2873 = vrot.lane.b32.xlu1 %v4923_v29, %s4548_s25 }
0x138c   :  { %2795 = vrot.lane.b32.xlu1 %v4921_v47, %s4548_s25 }
0x1390   :  { %3178 = vrot.lane.b32.xlu1 %v4921_v47, %s4549_s26 }
0x13fa   :  { %v2527_v31 = vpop.xlane.xlu0 %2526 }
0x13fb   :  { %v2531_v33 = vsub.f32 %v2444_v24, %v2527_v31 }
0x13fc   :  { %v2530_v34 = vpop.xlane.xlu1 %2529 }
0x13fd   :  { %v2533_v37 = vmul.f32 1.442695, %v2531_v33  ;;  %v2532_v38 = vsub.f32 %v2522_v40, %v2530_v34 }
0x13ff   :  { %4503 = vpow2.f32 %v2533_v37  ;;  %v2535_v39 = vmul.f32 1.442695, %v2532_v38 }
0x1400   :  { %v2624_v44 = vpop.permute.xlu1 %2623 }
0x1401   :  { %4505 = vpow2.f32 %v2535_v39  ;;  %4319 = vmatpush3.msra.mxu1 %v2624_v44 }
0x1402   :  { %4329 = vmatprep.subr.bf16.mxu1 %v4539_v8 }
0x1404   :  { %v2876_v61 = vpop.permute.xlu1 %2875 }
0x1408   :  { %v2874_v43 = vpop.permute.xlu1 %2873 }
0x1409   :  { %v4504_v45 = vpop.eup %4503 }
0x140a   :  { %v2537_v46 = vsel %vm188_vm2, %v4504_v45, 0.0 }
0x140b   :  { %v4506_v48 = vpop.eup %4505  ;;  %2538 = vadd.xlane.f32.xlu0 %v2537_v46 }
0x140c   :  { %v2540_v49 = vsel %vm188_vm2, %v4506_v48, 0.0  ;;  %v2796_v7 = vpop.permute.xlu1 %2795 }
0x140f   :  { %2541 = vadd.xlane.f32.xlu0 %v2540_v49 }
0x1410   :  { %v3179_v28 = vpop.permute.xlu1 %3178 }
0x1425   :  { %2547 = vrot.lane.b32.xlu0 %v4921_v47, %s4546_s23 }
0x1429   :  { %2797 = vrot.lane.b32.xlu0 %v4921_v47, %s4547_s24 }
0x1498   :  { %v2539_v50 = vpop.xlane.xlu0 %2538 }
0x1499   :  { %4507 = vrcp.f32 %v2539_v50 }
0x149c   :  { %v2542_v32 = vpop.xlane.xlu0 %2541 }
0x149d   :  { %4509 = vrcp.f32 %v2542_v32 }
0x14a0   :  { %v2548_v51 = vpop.permute.xlu0 %2547 }
0x14a1   :  { %4314 = vmatpush3.msra.mxu0 %v2548_v51 }
0x14a2   :  { %4323 = vmatprep.subr.bf16.mxu0 %v4539_v8 }
0x14a3   :  { %v4508_v53 = vpop.eup %4507 }
0x14a4   :  { %v2545_v54 = vmul.f32 %v4508_v53, %v4504_v45  ;;  %v2798_v2 = vpop.permute.xlu0 %2797 }
0x14a6   :  { %4316 = vmatmul.mubr.msk.f32.vlgmr.msra.gmra.mrb[38].mxu0 %vm188_vm2, %v2545_v54 }
0x14a7   :  { %v4510_v58 = vpop.eup %4509  ;;  %4324 = vmatpush3.bf16.msra.mxu0 %v2705_v55  ;;  %4325 = vmatprep.mubr.msk.bf16.mxu0 %vm4540_vm1, %v4539_v8 }
0x14a8   :  { %v2546_v59 = vmul.f32 %v4510_v58, %v4506_v48  ;;  %4335 = vmatprep.subr.mxu0 %v4539_v8 }
0x14aa   :  { %4321 = vmatmul.mubr.msk.f32.vlgmr.msra.gmra.mrb[38].mxu1 %vm188_vm2, %v2546_v59 }
0x14ab   :  { %4330 = vmatpush3.bf16.msra.mxu1 %v2752_v60  ;;  %4331 = vmatprep.mubr.msk.bf16.mxu1 %vm4540_vm1, %v4539_v8 }
0x14ac   :  { %4340 = vmatprep.subr.mxu1 %v4539_v8 }
0x14ae   :  { %4332 = vmatmul.mubr.msk.bf16.vlgmr.msra.gmra.mrb[40].mxu1 %vm188_vm2, %v2368_v21 }
0x14af   :  { %4342 = vmatprep.mubr.msk.f32.mxu1 %vm4540_vm1, %v4539_v8 }
0x14b4   :  { %4341 = vmatpush3.xpose.msk.msra.mxu1 %vm188_vm2, %v2876_v61 }
0x14b5   :  { %4350 = vmatprep.subr.mxu1 %v4539_v8 }
0x14b7   :  { %4343 = vmatmul.mubr.msk.f32.vlgmr.msra.gmra.mrb[44].mxu1 %vm188_vm2, %v2874_v43 }
0x14b8   :  { %4352 = vmatprep.mubr.msk.f32.mxu1 %vm4540_vm1, %v4539_v8 }
0x1579   :  { %v2619_v35 = vpop.f32.mrb[38].mxu0 }
0x157a   :  { %v4317_v36 = vpop.f32.mrb[39].mxu0 }
0x157d   :  { %v2695_v63 = vpop.f32.mrb[38].mxu1 }
0x157e   :  { %v2700_v0 = vpack.c.bf16 %v2695_v63, %v2619_v35  ;;  %v4322_v1 = vpop.f32.mrb[39].mxu1  ;;  %v3997_v35 = vld [vmem:[%s5183_s3 + $0x38] sm:$0xf] }
0x157f   :  { %v3131_v36 = vsel %vm851_vm3, %v3997_v35, 0 }
0x1580   :  { %4326 = vmatmul.mubr.msk.bf16.vlgmr.msra.gmra.mrb[40].mxu0 %vm188_vm2, %v2700_v0 }
0x1581   :  { %4336 = vmatpush3.xpose.msk.msra.mxu0 %vm188_vm2, %v2798_v2  ;;  %v2788_v3 = vpop.f32.mrb[40].mxu1  ;;  %4337 = vmatprep.mubr.msk.f32.mxu0 %vm4540_vm1, %v4539_v8 }
0x1582   :  { %v4333_v4 = vpop.f32.mrb[41].mxu1  ;;  %4345 = vmatprep.subr.mxu0 %v4539_v8 }
0x1583   :  { %v2791_v5 = vpop.f32.mrb[42].mxu1 }
0x1584   :  { %v4334_v6 = vpop.f32.mrb[43].mxu1 }
0x1588   :  { %4338 = vmatmul.mubr.msk.f32.vlgmr.msra.gmra.mrb[44].mxu0 %vm188_vm2, %v2796_v7 }
0x1589   :  { %4347 = vmatprep.mubr.msk.f32.mxu0 %vm4540_vm1, %v4539_v8 }
0x158a   :  { %v2947_v9 = vpop.f32.mrb[44].mxu1 }
0x158b   :  { %v2948_v10 = vadd.f32 %v2947_v9, %v4666_v62  ;;  %v4344_v11 = vpop.f32.mrb[45].mxu1 }
0x158d   :  { %v2954_v12 = vsel %vm188_vm2, %v2948_v10, -inf }
0x158e   :  { %2955 = vmax.xlane.f32.xlu0 %v2954_v12 }
0x15a4   :  { %3049 = vrot.lane.b32.xlu0 %v4923_v29, %s4550_s9 }
0x15a8   :  { %3176 = vrot.lane.b32.xlu0 %v4921_v47, %s4551_s10 }
0x15ac   :  { %3254 = vrot.lane.b32.xlu0 %v4923_v29, %s4551_s10 }
0x161b   :  { %v2956_v13 = vpop.xlane.xlu0 %2955 }
0x161c   :  { %v2958_v14 = vsub.f32 %v2948_v10, %v2956_v13 }
0x161e   :  { %v2961_v15 = vmul.f32 1.442695, %v2958_v14 }
0x161f   :  { %v3050_v16 = vpop.permute.xlu0 %3049 }
0x1620   :  { %4511 = vpow2.f32 %v2961_v15  ;;  %4351 = vmatpush3.msra.mxu1 %v3050_v16 }
0x1621   :  { %4361 = vmatprep.subr.mxu1 %v4539_v8 }
0x1623   :  { %v3177_v34 = vpop.permute.xlu0 %3176 }
0x1627   :  { %v3255_v38 = vpop.permute.xlu0 %3254 }
0x162a   :  { %v4512_v17 = vpop.eup %4511 }
0x162b   :  { %v2966_v18 = vsel %vm188_vm2, %v4512_v17, 0.0 }
0x162c   :  { %2967 = vadd.xlane.f32.xlu1 %v2966_v18 }
0x163d   :  { %3256 = vrot.lane.b32.xlu1 %v4923_v29, %s4549_s26 }
0x1653   :  { %v2741_v19 = vpop.f32.mrb[40].mxu0 }
0x1654   :  { %v5046_v20 = vadd.f32 %v2788_v3, %v2741_v19  ;;  %v4327_v21 = vpop.f32.mrb[41].mxu0 }
0x1655   :  { %v2744_v22 = vpop.f32.mrb[42].mxu0 }
0x1656   :  { %v5048_v23 = vadd.f32 %v2791_v5, %v2744_v22  ;;  %v4328_v24 = vpop.f32.mrb[43].mxu0 }
0x165b   :  { %v2869_v25 = vpop.f32.mrb[44].mxu0 }
0x165c   :  { %v2870_v26 = vadd.f32 %v2869_v25, %v4663_v57  ;;  %v4339_v40 = vpop.f32.mrb[45].mxu0 }
0x165e   :  { %v2951_v27 = vsel %vm188_vm2, %v2870_v26, -inf }
0x1661   :  { %2952 = vmax.xlane.f32.xlu1 %v2951_v27 }
0x16b9   :  { %v2968_v30 = vpop.xlane.xlu1 %2967 }
0x16ba   :  { %4513 = vrcp.f32 %v2968_v30 }
0x16bd   :  { %v3257_v37 = vpop.permute.xlu1 %3256 }
0x16c4   :  { %v4514_v31 = vpop.eup %4513 }
0x16c5   :  { %v2972_v33 = vmul.f32 %v4514_v31, %v4512_v17  ;;  %v4005_v17 = vld [vmem:[%s5183_s3 + $0x3c] sm:$0xf] }
0x16c6   :  { %v3512_v18 = vsel %vm851_vm3, %v4005_v17, 0  ;;  %v4014_v17 = vld [vmem:[%s5185_s6 + $0xc] ss:$0 sm:$0xff] }
0x16c7   :  { %4353 = vmatmul.mubr.msk.f32.vlgmr.msra.gmra.mrb[46].mxu1 %vm188_vm2, %v2972_v33 }
0x16c8   :  { %4362 = vmatpush3.xpose.msk.msra.mxu1 %vm188_vm2, %v3179_v28  ;;  %4363 = vmatprep.mubr.msk.f32.mxu1 %vm4540_vm1, %v4539_v8 }
0x16c9   :  { %4366 = vmatprep.subr.mxu1 %v4539_v8 }
0x16cb   :  { %4364 = vmatmul.mubr.msk.f32.vlgmr.msra.gmra.mrb[48].mxu1 %vm188_vm2, %v3177_v34 }
0x16cc   :  { %4367 = vmatpush3.xpose.msk.msra.mxu1 %vm188_vm2, %v3257_v37  ;;  %4368 = vmatprep.mubr.msk.f32.mxu1 %vm4540_vm1, %v4539_v8 }
0x16cd   :  { %4376 = vmatprep.subr.mxu1 %v4539_v8 }
0x16cf   :  { %4369 = vmatmul.mubr.msk.f32.vlgmr.msra.gmra.mrb[50].mxu1 %vm188_vm2, %v3255_v38 }
0x16d0   :  { %4378 = vmatprep.mubr.msk.f32.mxu1 %vm4540_vm1, %v4539_v8 }
0x16ee   :  { %v2953_v39 = vpop.xlane.xlu1 %2952 }
0x16ef   :  { %v2957_v44 = vsub.f32 %v2870_v26, %v2953_v39 }
0x16f1   :  { %v2959_v45 = vmul.f32 1.442695, %v2957_v44 }
0x16f3   :  { %4515 = vpow2.f32 %v2959_v45 }
0x16fd   :  { %v4516_v46 = vpop.eup %4515 }
0x16fe   :  { %v2963_v48 = vsel %vm188_vm2, %v4516_v46, 0.0 }
0x16ff   :  { %2964 = vadd.xlane.f32.xlu0 %v2963_v48 }
0x1715   :  { %2973 = vrot.lane.b32.xlu0 %v4921_v47, %s4550_s9 }
0x1719   :  { %3430 = vrot.lane.b32.xlu0 %v4923_v29, %s4552_s0 }
0x178c   :  { %v2965_v49 = vpop.xlane.xlu0 %2964 }
0x178d   :  { %4517 = vrcp.f32 %v2965_v49 }
0x1790   :  { %v2974_v50 = vpop.permute.xlu0 %2973 }
0x1791   :  { %4346 = vmatpush3.msra.mxu0 %v2974_v50 }
0x1792   :  { %4355 = vmatprep.subr.bf16.mxu0 %v4539_v8 }
0x1794   :  { %v3431_v32 = vpop.permute.xlu0 %3430 }
0x1795   :  { %4377 = vmatpush3.msra.mxu1 %v3431_v32 }
0x1796   :  { %4387 = vmatprep.subr.bf16.mxu1 %v4539_v8 }
0x1797   :  { %v4518_v51 = vpop.eup %4517 }
0x1798   :  { %v2971_v52 = vmul.f32 %v4518_v51, %v4516_v46 }
0x179a   :  { %4348 = vmatmul.mubr.msk.f32.vlgmr.msra.gmra.mrb[46].mxu0 %vm188_vm2, %v2971_v52  ;;  %v3121_v53 = vpop.f32.mrb[46].mxu1 }
0x179b   :  { %v4354_v54 = vpop.f32.mrb[47].mxu1  ;;  %4357 = vmatprep.mubr.msk.bf16.mxu0 %vm4540_vm1, %v4539_v8  ;;  %4356 = vmatpush3.bf16.msra.mxu0 %v3131_v36 }
0x179c   :  { %4371 = vmatprep.subr.mxu0 %v4539_v8 }
0x179e   :  { %v3250_v29 = vpop.f32.mrb[48].mxu1 }
0x179f   :  { %v3251_v55 = vadd.f32 %v3250_v29, %v4663_v57  ;;  %v4365_v56 = vpop.f32.mrb[49].mxu1 }
0x17a1   :  { %v3332_v58 = vsel %vm188_vm2, %v3251_v55, -inf }
0x17a2   :  { %v3328_v59 = vpop.f32.mrb[50].mxu1  ;;  %3333 = vmax.xlane.f32.xlu1 %v3332_v58 }
0x17a3   :  { %v3329_v60 = vadd.f32 %v3328_v59, %v4666_v62  ;;  %v4370_v61 = vpop.f32.mrb[51].mxu1 }
0x17a5   :  { %v3335_v43 = vsel %vm188_vm2, %v3329_v60, -inf }
0x17a6   :  { %3336 = vmax.xlane.f32.xlu1 %v3335_v43 }
0x182f   :  { %v3334_v57 = vpop.xlane.xlu1 %3333 }
0x1830   :  { %v3338_v63 = vsub.f32 %v3251_v55, %v3334_v57 }
0x1832   :  { %v3340_v0 = vmul.f32 1.442695, %v3338_v63 }
0x1833   :  { %v3337_v1 = vpop.xlane.xlu1 %3336 }
0x1834   :  { %4519 = vpow2.f32 %v3340_v0  ;;  %v3339_v2 = vsub.f32 %v3329_v60, %v3337_v1 }
0x1836   :  { %v3342_v62 = vmul.f32 1.442695, %v3339_v2 }
0x1838   :  { %4521 = vpow2.f32 %v3342_v62 }
0x183e   :  { %v4520_v3 = vpop.eup %4519 }
0x183f   :  { %v3344_v4 = vsel %vm188_vm2, %v4520_v3, 0.0 }
0x1840   :  { %3345 = vadd.xlane.f32.xlu1 %v3344_v4 }
0x1842   :  { %v4522_v5 = vpop.eup %4521 }
0x1843   :  { %v3347_v6 = vsel %vm188_vm2, %v4522_v5, 0.0 }
0x1844   :  { %3348 = vadd.xlane.f32.xlu1 %v3347_v6 }
0x1855   :  { %3354 = vrot.lane.b32.xlu1 %v4921_v47, %s4552_s0 }
0x186d   :  { %v3045_v7 = vpop.f32.mrb[46].mxu0 }
0x186e   :  { %v3126_v9 = vpack.c.bf16 %v3121_v53, %v3045_v7  ;;  %v4349_v10 = vpop.f32.mrb[47].mxu0 }
0x1870   :  { %4358 = vmatmul.mubr.msk.bf16.vlgmr.msra.gmra.mrb[48].mxu0 %vm188_vm2, %v3126_v9  ;;  %v4009_v9 = vld [vmem:[%s5185_s6 + $0xb] ss:$0 sm:$0xff] }
0x1871   :  { %4373 = vmatprep.mubr.msk.f32.mxu0 %vm4540_vm1, %v4539_v8 }
0x18cd   :  { %v3346_v11 = vpop.xlane.xlu1 %3345 }
0x18ce   :  { %4523 = vrcp.f32 %v3346_v11 }
0x18d1   :  { %v3349_v12 = vpop.xlane.xlu1 %3348 }
0x18d2   :  { %4525 = vrcp.f32 %v3349_v12 }
0x18d5   :  { %v3355_v13 = vpop.permute.xlu1 %3354 }
0x18d6   :  { %4372 = vmatpush3.msra.mxu0 %v3355_v13 }
0x18d7   :  { %4381 = vmatprep.subr.bf16.mxu0 %v4539_v8 }
0x18d8   :  { %v4524_v14 = vpop.eup %4523 }
0x18d9   :  { %v3352_v15 = vmul.f32 %v4524_v14, %v4520_v3  ;;  %v4008_v3 = vld [vmem:[%s5185_s6 + $0xa] ss:$0 sm:$0xff]  ;;  %v4441_v14 = vld [vmem:[%s5188_s5 + $0x20] sm:$0xff]  }
0x18db   :  { %4374 = vmatmul.mubr.msk.f32.vlgmr.msra.gmra.mrb[52].mxu0 %vm188_vm2, %v3352_v15  ;;  %v4442_v15 = vld [vmem:[%s5188_s5 + $0x28] sm:$0xff]  }
0x18dc   :  { %v4526_v47 = vpop.eup %4525  ;;  %4383 = vmatprep.mubr.msk.bf16.mxu0 %vm4540_vm1, %v4539_v8  ;;  %4382 = vmatpush3.bf16.msra.mxu0 %v3512_v18 }
0x18dd   :  { %v3353_v16 = vmul.f32 %v4526_v47, %v4522_v5  ;;  %4395 = vmatprep.subr.bf16.mxu0 %v4539_v8  ;;  %v4443_v47 = vld [vmem:[%s5188_s5 + $0x30] sm:$0xff]  }
0x18df   :  { %4379 = vmatmul.mubr.msk.f32.vlgmr.msra.gmra.mrb[52].mxu1 %vm188_vm2, %v3353_v16  ;;  %v4444_v16 = vld [vmem:[%s5188_s5 + $0x38] sm:$0xff]  }
0x18e0   :  { %4391 = vmatprep.mubr.msk.bf16.mxu1 %vm4540_vm1, %v4539_v8 }
0x1943   :  { %v3167_v19 = vpop.f32.mrb[48].mxu0 }
0x1944   :  { %v3174_v21 = vadd.f32 %v3167_v19, %v5046_v20  ;;  %v4359_v22 = vpop.f32.mrb[49].mxu0  ;;  %v4007_v20 = vld [vmem:[%s5185_s6 + $0x9] ss:$0 sm:$0xff] }
0x1945   :  { %v3170_v24 = vpop.f32.mrb[50].mxu0 }
0x1946   :  { %v3175_v25 = vadd.f32 %v3170_v24, %v5048_v23  ;;  %v4360_v26 = vpop.f32.mrb[51].mxu0 }
0x19ae   :  { %v3426_v40 = vpop.f32.mrb[52].mxu0 }
0x19af   :  { %v4375_v27 = vpop.f32.mrb[53].mxu0 }
0x19b2   :  { %v3502_v28 = vpop.f32.mrb[52].mxu1 }
0x19b3   :  { %v3507_v30 = vpack.c.bf16 %v3502_v28, %v3426_v40  ;;  %v4380_v31 = vpop.f32.mrb[53].mxu1 }
0x19b5   :  { %4384 = vmatmul.mubr.msk.bf16.vlgmr.msra.gmra.mrb[56].mxu0 %vm188_vm2, %v3507_v30 }
0x19b6   :  { %4403 = vmatprep.mubr.msk.bf16.mxu0 %vm4540_vm1, %v4539_v8  ;;  %4396 = vmatpush3.bf16.msra.mxu0 %v4441_v14 }
0x19b7   :  { %4397 = vmatprep.subr.bf16.mxu0 %v4539_v8 }
0x19ba   :  { %4398 = vmatpush3.bf16.msra.mxu0 %v4442_v15 }
0x19bb   :  { %4399 = vmatprep.subr.bf16.mxu0 %v4539_v8 }
0x19be   :  { %4400 = vmatpush3.bf16.msra.mxu0 %v4443_v47 }
0x19bf   :  { %4401 = vmatprep.subr.bf16.mxu0 %v4539_v8 }
0x19c2   :  { %4402 = vmatpush3.bf16.msra.mxu0 %v4444_v16  ;;  %v4033_v16 = vld [vmem:[%s5185_s6 + $0xf] ss:$0 sm:$0xff] }
0x1a88   :  { %v3548_v33 = vpop.f32.mrb[56].mxu0 }
0x1a89   :  { %v3555_v34 = vadd.f32 %v3548_v33, %v3174_v21  ;;  %v4385_v37 = vpop.f32.mrb[57].mxu0 }
0x1a8a   :  { %v3551_v38 = vpop.f32.mrb[58].mxu0 }
0x1a8b   :  { %v3557_v23 = vadd.f32 %v3555_v34, %v4911_v42  ;;  %v3556_v39 = vadd.f32 %v3551_v38, %v3175_v25  ;;  %v4386_v44 = vpop.f32.mrb[59].mxu0  ;;  %v4439_v42 = vld [vmem:[%s5187_s4 + $0x10] sm:$0xff]  }
0x1a8c   :  { %4388 = vmatpush3.bf16.msra.mxu1 %v4439_v42 }
0x1a8d   :  { %v3563_v45 = vadd.f32 %v4007_v20, %v3557_v23  ;;  %v3558_v46 = vadd.f32 %v3556_v39, %v4909_v41  ;;  %v4440_v41 = vld [vmem:[%s5187_s4 + $0x18] sm:$0xff]   ;;  %4389 = vmatprep.subr.bf16.mxu1 %v4539_v8 }
0x1a8f   :  { %v3564_v48 = vadd.f32 %v4007_v20, %v3558_v46  ;;  %v3565_v49 = vsel %vm34_vm0, %v3563_v45, 0.0  ;;  %v3573_v50 = vmul.f32 %v3563_v45, %v3563_v45 }
0x1a90   :  { %3566 = vadd.xlane.f32.xlu0 %v3565_v49  ;;  %4390 = vmatpush3.bf16.msra.mxu1 %v4440_v41 }
0x1a91   :  { %v3568_v32 = vsel %vm34_vm0, %v3564_v48, 0.0  ;;  %v3575_v51 = vsel %vm34_vm0, %v3573_v50, 0.0  ;;  %v3574_v52 = vmul.f32 %v3564_v48, %v3564_v48  ;;  %4407 = vmatprep.subr.bf16.mxu1 %v4539_v8 }
0x1a92   :  { %3569 = vadd.xlane.f32.xlu1 %v3568_v32  ;;  %v4026_v32 = vld [vmem:[%s5185_s6 + $0xd] ss:$0 sm:$0xff] }
0x1a93   :  { %v3578_v53 = vsel %vm34_vm0, %v3574_v52, 0.0 }
0x1a94   :  { %3576 = vadd.xlane.f32.xlu0 %v3575_v51 }
0x1a98   :  { %3579 = vadd.xlane.f32.xlu0 %v3578_v53 }
0x1b1d   :  { %v3567_v54 = vpop.xlane.xlu0 %3566 }
0x1b1e   :  { %v3571_v29 = vmul.f32 0.03125, %v3567_v54 }
0x1b1f   :  { %v3570_v55 = vpop.xlane.xlu1 %3569 }
0x1b20   :  { %v3583_v58 = vmul.f32 %v3571_v29, %v3571_v29  ;;  %v3572_v59 = vmul.f32 0.03125, %v3570_v55  ;;  %v3587_v1 = vsub.f32 %v3563_v45, %v3571_v29 }
0x1b21   :  { %v3577_v56 = vpop.xlane.xlu0 %3576 }
0x1b22   :  { %v3581_v60 = vmul.f32 0.03125, %v3577_v56  ;;  %v3584_v35 = vmul.f32 %v3572_v59, %v3572_v59  ;;  %v3588_v4 = vsub.f32 %v3564_v48, %v3572_v59 }
0x1b24   :  { %v3585_v61 = vsub.f32 %v3581_v60, %v3583_v58 }
0x1b25   :  { %v3580_v43 = vpop.xlane.xlu0 %3579 }
0x1b26   :  { %v3589_v36 = vadd.f32 1e-12, %v3585_v61  ;;  %v3582_v57 = vmul.f32 0.03125, %v3580_v43 }
0x1b28   :  { %4527 = vrsqrt.f32 %v3589_v36  ;;  %v3586_v63 = vsub.f32 %v3582_v57, %v3584_v35  ;;  %v4445_v35 = vld [vmem:[%s5189_s7] sm:$0xff]   ;;  %v4446_v36 = vld [vmem:[%s5189_s7 + $0x8] sm:$0xff]  }
0x1b2a   :  { %v3590_v0 = vadd.f32 1e-12, %v3586_v63 }
0x1b2c   :  { %4529 = vrsqrt.f32 %v3590_v0 }
0x1b32   :  { %v4528_v2 = vpop.eup %4527 }
0x1b33   :  { %v3593_v62 = vmul.f32 %v4528_v2, %v3587_v1 }
0x1b35   :  { %v3599_v7 = vmul.f32 %v4008_v3, %v3593_v62 }
0x1b36   :  { %v4530_v5 = vpop.eup %4529 }
0x1b37   :  { %v3594_v6 = vmul.f32 %v4530_v5, %v3588_v4  ;;  %v3605_v11 = vadd.f32 %v4009_v9, %v3599_v7 }
0x1b39   :  { %v3600_v10 = vmul.f32 %v4008_v3, %v3594_v6 }
0x1b3b   :  { %v3606_v12 = vadd.f32 %v4009_v9, %v3600_v10 }
0x1b3d   :  { %v3607_v13 = vpack.c.bf16 %v3606_v12, %v3605_v11 }
0x1b3f   :  { %4392 = vmatmul.mubr.msk.bf16.vlgmr.msra.gmra.mrb[56].mxu1 %vm34_vm0, %v3607_v13 }
0x1b40   :  { %4411 = vmatprep.mubr.msk.bf16.mxu1 %vm4540_vm1, %v4539_v8  ;;  %4408 = vmatpush3.bf16.msra.mxu1 %v4445_v35 }
0x1b41   :  { %4409 = vmatprep.subr.bf16.mxu1 %v4539_v8  ;;  %v4032_v8 = vld [vmem:[%s5185_s6 + $0xe] ss:$0 sm:$0xff] }
0x1b44   :  { %4410 = vmatpush3.bf16.msra.mxu1 %v4446_v36 }
0x1c12   :  { %v3666_v18 = vpop.f32.mrb[56].mxu1 }
0x1c13   :  { %v3667_v19 = vadd.f32 %v4014_v17, %v3666_v18  ;;  %v4393_v21 = vpop.f32.mrb[57].mxu1 }
0x1c14   :  { %v3669_v22 = vpop.f32.mrb[58].mxu1 }
0x1c15   :  { %v3673_v24 = vmul.f32 %v3667_v19, %v3667_v19  ;;  %v3670_v25 = vadd.f32 %v4014_v17, %v3669_v22  ;;  %v4394_v26 = vpop.f32.mrb[59].mxu1 }
0x1c17   :  { %v3675_v40 = vmul.f32 %v3673_v24, %v3667_v19  ;;  %v3674_v27 = vmul.f32 %v3670_v25, %v3670_v25 }
0x1c19   :  { %v3677_v28 = vmul.f32 0.044715, %v3675_v40  ;;  %v3676_v30 = vmul.f32 %v3674_v27, %v3670_v25 }
0x1c1b   :  { %v3679_v31 = vadd.f32 %v3677_v28, %v3667_v19  ;;  %v3678_v33 = vmul.f32 0.044715, %v3676_v30 }
0x1c1d   :  { %v3681_v34 = vmul.f32 0.7978846, %v3679_v31  ;;  %v3680_v37 = vadd.f32 %v3678_v33, %v3670_v25 }
0x1c1f   :  { %4531 = vtanh.f32 %v3681_v34  ;;  %v3682_v20 = vmul.f32 0.7978846, %v3680_v37 }
0x1c21   :  { %4533 = vtanh.f32 %v3682_v20 }
0x1c29   :  { %v4532_v38 = vpop.eup %4531 }
0x1c2a   :  { %v3685_v23 = vadd.f32 1.0, %v4532_v38 }
0x1c2b   :  { %v4534_v39 = vpop.eup %4533 }
0x1c2c   :  { %v3687_v44 = vmul.f32 0.5, %v3685_v23  ;;  %v3686_v45 = vadd.f32 1.0, %v4534_v39 }
0x1c2e   :  { %v3688_v46 = vmul.f32 0.5, %v3686_v45  ;;  %v3689_v48 = vmul.f32 %v3687_v44, %v3667_v19 }
0x1c30   :  { %v3690_v49 = vmul.f32 %v3688_v46, %v3670_v25 }
0x1c32   :  { %v3691_v50 = vpack.c.bf16 %v3690_v49, %v3689_v48 }
0x1c34   :  { %4404 = vmatmul.mubr.msk.bf16.vlgmr.msra.gmra.mrb[60].mxu0 %vm1875_vm4, %v3691_v50  ;;  %v4034_v50 = vld [vmem:[%s5184_s2 + $0x2] ss:$0 sm:$0xff] }
0x1d07   :  { %v3766_v51 = vpop.f32.mrb[60].mxu0 }
0x1d08   :  { %v3767_v52 = vadd.f32 %v4026_v32, %v3766_v51  ;;  %v4405_v53 = vpop.f32.mrb[61].mxu0 }
0x1d09   :  { %v3769_v42 = vpop.f32.mrb[62].mxu0 }
0x1d0a   :  { %v3773_v41 = vadd.f32 %v3767_v52, %v3605_v11  ;;  %v3770_v54 = vadd.f32 %v4026_v32, %v3769_v42  ;;  %v4406_v29 = vpop.f32.mrb[63].mxu0 }
0x1d0c   :  { %v3774_v55 = vadd.f32 %v3770_v54, %v3606_v12  ;;  %v3775_v56 = vsel %vm34_vm0, %v3773_v41, 0.0  ;;  %v3783_v61 = vmul.f32 %v3773_v41, %v3773_v41 }
0x1d0d   :  { %3776 = vadd.xlane.f32.xlu0 %v3775_v56 }
0x1d0e   :  { %v3784_v58 = vmul.f32 %v3774_v55, %v3774_v55  ;;  %v3778_v60 = vsel %vm34_vm0, %v3774_v55, 0.0  ;;  %v3785_v43 = vsel %vm34_vm0, %v3783_v61, 0.0 }
0x1d10   :  { %v3788_v59 = vsel %vm34_vm0, %v3784_v58, 0.0 }
0x1d11   :  { %3789 = vadd.xlane.f32.xlu1 %v3788_v59  ;;  %3779 = vadd.xlane.f32.xlu0 %v3778_v60 }
0x1d15   :  { %3786 = vadd.xlane.f32.xlu0 %v3785_v43 }
0x1d9a   :  { %v3777_v57 = vpop.xlane.xlu0 %3776 }
0x1d9b   :  { %v3781_v1 = vmul.f32 0.03125, %v3777_v57 }
0x1d9d   :  { %v3793_v5 = vmul.f32 %v3781_v1, %v3781_v1  ;;  %v3797_v14 = vsub.f32 %v3773_v41, %v3781_v1 }
0x1d9e   :  { %v3790_v63 = vpop.xlane.xlu1 %3789  ;;  %v3780_v0 = vpop.xlane.xlu0 %3779 }
0x1d9f   :  { %v3782_v2 = vmul.f32 0.03125, %v3780_v0  ;;  %v3792_v62 = vmul.f32 0.03125, %v3790_v63 }
0x1da1   :  { %v3794_v3 = vmul.f32 %v3782_v2, %v3782_v2  ;;  %v3798_v12 = vsub.f32 %v3774_v55, %v3782_v2 }
0x1da2   :  { %v3787_v4 = vpop.xlane.xlu0 %3786 }
0x1da3   :  { %v3796_v6 = vsub.f32 %v3792_v62, %v3794_v3  ;;  %v3791_v7 = vmul.f32 0.03125, %v3787_v4 }
0x1da5   :  { %v3800_v9 = vadd.f32 1e-12, %v3796_v6  ;;  %v3795_v10 = vsub.f32 %v3791_v7, %v3793_v5 }
0x1da7   :  { %4535 = vrsqrt.f32 %v3800_v9  ;;  %v3799_v11 = vadd.f32 1e-12, %v3795_v10 }
0x1da9   :  { %4537 = vrsqrt.f32 %v3799_v11 }
0x1db1   :  { %v4536_v13 = vpop.eup %4535 }
0x1db2   :  { %v3804_v15 = vmul.f32 %v4536_v13, %v3798_v12 }
0x1db3   :  { %v4538_v47 = vpop.eup %4537 }
0x1db4   :  { %v3810_v17 = vmul.f32 %v4032_v8, %v3804_v15  ;;  %v3803_v18 = vmul.f32 %v4538_v47, %v3797_v14 }
0x1db6   :  { %v3816_v19 = vadd.f32 %v4033_v16, %v3810_v17  ;;  %v3809_v21 = vmul.f32 %v4032_v8, %v3803_v18 }
0x1db8   :  { %v3824_v22 = vsel %vm34_vm0, %v3816_v19, 0.0  ;;  %v3815_v24 = vadd.f32 %v4033_v16, %v3809_v21 }
0x1db9   :  { %v3825_v25 = vrot.slane %v3824_v22, 4 }
0x1dba   :  { %v3817_v26 = vsel %vm34_vm0, %v3815_v24, 0.0 }
0x1dbb   :  { %v3826_v40 = vadd.f32 %v3825_v25, %v3824_v22  ;;  %v3818_v27 = vrot.slane %v3817_v26, 4 }
0x1dbd   :  { %v3827_v28 = vrot.slane %v3826_v40, 2  ;;  %v3819_v30 = vadd.f32 %v3818_v27, %v3817_v26 }
0x1dbf   :  { %v3828_v31 = vadd.f32 %v3827_v28, %v3826_v40  ;;  %v3820_v33 = vrot.slane %v3819_v30, 2 }
0x1dc1   :  { %v3829_v34 = vrot.slane %v3828_v31, 1  ;;  %v3821_v37 = vadd.f32 %v3820_v33, %v3819_v30 }
0x1dc3   :  { %v3830_v20 = vadd.f32 %v3829_v34, %v3828_v31  ;;  %v3822_v38 = vrot.slane %v3821_v37, 1 }
0x1dc5   :  { %v3832_v23 = vpack.c.bf16 %v3830_v20, %v3830_v20  ;;  %v3823_v39 = vadd.f32 %v3822_v38, %v3821_v37 }
0x1dc7   :  { %v3831_v44 = vpack.c.bf16 %v3823_v39, %v3823_v39  ;;  %v3845_v45 = vunpack.c.l.b16 %v3832_v23 }
0x1dc9   :  { %v3844_v46 = vunpack.c.l.b16 %v3831_v44 }
0x1dcb   :  { %v3847_v48 = vsel %vm3846_vm5, %v3845_v45, %v3844_v46 }
0x1dcc   :  { %v3848_v49 = vpack.c.b16 %v3847_v48, %v3847_v48 }
0x1dce   :  { %4412 = vmatmul.mubr.msk.bf16.vlgmr.msra.gmra.mrb[60].mxu1 %vm34_vm0, %v3848_v49 }
0x1ea1   :  { %v3898_v32 = vpop.f32.mrb[60].mxu1 }
0x1ea2   :  { %v3899_v51 = vadd.f32 %v4034_v50, %v3898_v32  ;;  %v4413_v52 = vpop.f32.mrb[61].mxu1 }
0x1ea3   :  { %v3901_v53 = vpop.f32.mrb[62].mxu1 }
0x1ea4   :  { %3904 = vst [vmem:[%s5190_s8] sm:$0x3] %v3899_v51  ;;  %v4414_v42 = vpop.f32.mrb[63].mxu1 }

</bundles_post_ra>
